<compile_context>
chip_gen: v7x
topology: tpu7x:2x2x1
jax: 0.10.0
libtpu: 0.0.40
codegen_flags: <defaults>
</compile_context>

<pallas_src>
import functools

import jax
import jax.numpy as jnp
from jax import lax
from jax.experimental import pallas as pl
from jax.experimental.pallas import tpu as pltpu

KH = KW = 3           # 3x3 conv, stride 1, padding 1 (standard Darknet19 conv)
NEG_SLOPE = 0.01      # nn.LeakyReLU default
BN_EPS = 1e-5         # nn.BatchNorm2d default
LANE = 128
SUBLANE_BF16 = 16     # bf16 sublane packing (keeps the in-kernel reshape free)


def _round_up(x, m):
    return (x + m - 1) // m * m


def _default_vmem_limit():
    """3/4 of physical per-core VMEM, capped at 100 MiB (v7x-safe headroom)."""
    try:
        cap = pltpu.get_tpu_info().vmem_capacity_bytes
    except Exception:
        cap = 64 * 1024 * 1024
    return int(min(cap * 3 // 4, 100 * 1024 * 1024))


_VMEM_LIMIT = _default_vmem_limit()


def conv_bn_lrelu_kernel(x_ref, w_ref, scale_ref, bias_ref, o_ref):
    """Fused 3x3 conv + folded BN + LeakyReLU for one (row-slab, Cout-tile).

    x_ref:     (1, TH+3, Wp, Cin)  bf16  padded, overlapping input row slab
    w_ref:     (3, 3, Cin, TC)     bf16  conv weights (lane-dense Cout tile)
    scale_ref: (1, TC)             f32   folded BN scale
    bias_ref:  (1, TC)             f32   folded BN bias (includes conv bias)
    o_ref:     (1, TH, Wp, TC)           output tile (cols >= W are discarded)
    """
    _, THp, Wp, Cin = x_ref.shape
    TH = o_ref.shape[1]
    TC = o_ref.shape[3]
    M = TH * Wp
    L = (TH + 2) * Wp

    # Load the slab once; merging (THp, Wp) -> THp*Wp is layout-free because
    # the wrapper pads the width so that Wp % 16 == 0 (bf16 sublane packing).
    x_flat = x_ref[0].reshape(THp * Wp, Cin)

    # Hoist the column (kw) shift out of the kh loop: at most 2 sublane
    # re-layouts total (kw = 1, 2) instead of 6 unaligned slices.
    # TODO(synk): pltpu.roll could route these +1/+2 shifts to the idle XLU.
    x_sh = [x_flat[kw:kw + L, :] for kw in range(KW)]

    acc = None
    for kh in range(KH):
        base = kh * Wp                       # multiple of Wp => sublane-aligned
        for kw in range(KW):
            # One shifted, aligned view per tap feeding an MXU matmul.  Wrap /
            # bleed values only land in output columns >= W, which the wrapper
            # slices off.
            tap = x_sh[kw][base:base + M, :]
            contrib = jnp.dot(tap, w_ref[kh, kw],
                              preferred_element_type=jnp.float32)
            acc = contrib if acc is None else acc + contrib

    # Folded BatchNorm (eval mode) + conv bias, then LeakyReLU — all in f32.
    y = acc * scale_ref[...] + bias_ref[...]
    y = jnp.maximum(y, NEG_SLOPE * y)
    o_ref[0] = y.reshape(TH, Wp, TC).astype(o_ref.dtype)


@functools.partial(jax.jit, static_argnames=("tile_h", "out_dtype"))
def conv_layer_forward(x_nchw, w_oihw, conv_b, bn_gamma, bn_beta, bn_mean,
                       bn_var, *, tile_h=None, out_dtype=jnp.float32):
    """Forward pass matching PyTorch ConvLayer (eval-mode BN).

    x_nchw: (N, Cin, H, W) float32; w_oihw: (Cout, Cin, 3, 3).
    Returns (N, Cout, H, W) in `out_dtype` (f32 default; bf16 allowed when the
    consumer is the next ConvLayer).
    """
    N, Cin, H, W = x_nchw.shape
    Cout = w_oihw.shape[0]

    # Row tile: full image for small H, else 32 rows (halo ~9%, fewer steps).
    if tile_h is None:
        TH = H if H <= 32 else 32
    else:
        TH = min(tile_h, H)
    H_t = _round_up(H, TH)
    nT = H_t // TH
    THp = TH + 3                            # +1 top halo, +1 bottom halo, +1 slack
    Wp = _round_up(W + 2, SUBLANE_BF16)     # left pad 1, right pad >= 1, 16-aligned
    assert Wp >= W + 2                      # tap wrap must land in discarded cols
    Cout_p = _round_up(Cout, LANE)          # lane-dense output channels
    TC = 256 if Cout_p % 256 == 0 else 128  # fill the 256-wide MXU on v6e/v7x
    nC = Cout_p // TC
    B = N * nT

    # --- XLA glue: layout, bf16 cast (once), padding, row slabs, BN fold -----
    x_nhwc = jnp.transpose(x_nchw, (0, 2, 3, 1)).astype(jnp.bfloat16)   # NHWC bf16
    x_pad = jnp.pad(
        x_nhwc,
        ((0, 0), (1, (H_t - H) + 2), (1, Wp - W - 1), (0, 0)),
    )                                                                   # (N, H_t+3, Wp, Cin)
    if nT == 1:
        x_tiles = x_pad                                                 # no copy
    else:
        # Overlapping row slabs (halo duplication only 3/TH rows, in bf16).
        x_tiles = jnp.stack(
            [x_pad[:, t * TH:t * TH + THp] for t in range(nT)], axis=1
        ).reshape(B, THp, Wp, Cin)

    w_hwio = jnp.transpose(w_oihw, (2, 3, 1, 0))                        # (3,3,Cin,Cout)
    w_hwio = jnp.pad(w_hwio, ((0, 0), (0, 0), (0, 0), (0, Cout_p - Cout)))
    w_hwio = w_hwio.astype(jnp.bfloat16)

    scale = bn_gamma / jnp.sqrt(bn_var + BN_EPS)                        # (Cout,)
    bias = (conv_b - bn_mean) * scale + bn_beta                         # (Cout,)
    scale2 = jnp.pad(scale, (0, Cout_p - Cout)).reshape(1, Cout_p).astype(jnp.float32)
    bias2 = jnp.pad(bias, (0, Cout_p - Cout)).reshape(1, Cout_p).astype(jnp.float32)

    # --- grid-axis order: keep the expensive-to-refetch operand resident -----
    weight_bytes = KH * KW * Cin * Cout_p * 2          # whole (padded) weight, bf16
    input_bytes = B * THp * Wp * Cin * 2               # all input slabs, bf16
    swap_grid = (B - 1) * weight_bytes > (nC - 1) * input_bytes
    if swap_grid:
        grid = (nC, B)                                  # b innermost: weights resident
        x_map = lambda c, b: (b, 0, 0, 0)
        w_map = lambda c, b: (0, 0, 0, c)
        s_map = lambda c, b: (0, c)
        o_map = lambda c, b: (b, 0, 0, c)
    else:
        grid = (B, nC)                                  # c innermost: input slab resident
        x_map = lambda b, c: (b, 0, 0, 0)
        w_map = lambda b, c: (0, 0, 0, c)
        s_map = lambda b, c: (0, c)
        o_map = lambda b, c: (b, 0, 0, c)

    out_tiles = pl.pallas_call(
        conv_bn_lrelu_kernel,
        out_shape=jax.ShapeDtypeStruct((B, TH, Wp, Cout_p), out_dtype),
        grid_spec=pltpu.PrefetchScalarGridSpec(
            num_scalar_prefetch=0,
            grid=grid,
            in_specs=[
                pl.BlockSpec((1, THp, Wp, Cin), x_map),
                pl.BlockSpec((KH, KW, Cin, TC), w_map),
                pl.BlockSpec((1, TC), s_map),
                pl.BlockSpec((1, TC), s_map),
            ],
            out_specs=pl.BlockSpec((1, TH, Wp, TC), o_map),
        ),
        compiler_params=pltpu.CompilerParams(
            dimension_semantics=("parallel", "parallel"),
            vmem_limit_bytes=_VMEM_LIMIT,
        ),
    )(x_tiles, w_hwio, scale2, bias2)

    out_nhwc = out_tiles.reshape(N, H_t, Wp, Cout_p)[:, :H, :W, :Cout]
    return jnp.transpose(out_nhwc, (0, 3, 1, 2))                        # back to NCHW


def reference_forward(x_nchw, w_oihw, conv_b, bn_gamma, bn_beta, bn_mean, bn_var):
    """Pure-JAX f32 reference (lax conv) for correctness checking."""
    y = lax.conv_general_dilated(
        x_nchw, w_oihw, window_strides=(1, 1), padding=((1, 1), (1, 1)),
        dimension_numbers=("NCHW", "OIHW", "NCHW"),
    )
    y = y + conv_b.reshape(1, -1, 1, 1)
    y = (y - bn_mean.reshape(1, -1, 1, 1)) / jnp.sqrt(
        bn_var.reshape(1, -1, 1, 1) + BN_EPS)
    y = y * bn_gamma.reshape(1, -1, 1, 1) + bn_beta.reshape(1, -1, 1, 1)
    return jnp.where(y > 0, y, NEG_SLOPE * y)


def _make_params(key, cin, cout):
    kw, kb, kg, kbe, km, kv = jax.random.split(key, 6)
    w = jax.random.normal(kw, (cout, cin, KH, KW), dtype=jnp.float32) * 0.1
    conv_b = jax.random.normal(kb, (cout,), dtype=jnp.float32) * 0.05
    bn_gamma = 1.0 + 0.1 * jax.random.normal(kg, (cout,), dtype=jnp.float32)
    bn_beta = 0.1 * jax.random.normal(kbe, (cout,), dtype=jnp.float32)
    bn_mean = 0.1 * jax.random.normal(km, (cout,), dtype=jnp.float32)
    bn_var = jnp.abs(1.0 + 0.1 * jax.random.normal(kv, (cout,), dtype=jnp.float32))
    return w, conv_b, bn_gamma, bn_beta, bn_mean, bn_var


if __name__ == "__main__":
    key = jax.random.PRNGKey(0)
    k1, k2, k3, k4 = jax.random.split(key, 4)

    # Case 1: single-slab path (TH = H), N=2, Cin=4, 16x16, Cout=8.
    N, Cin, H, W, Cout = 2, 4, 16, 16, 8
    x = jax.random.uniform(k1, (N, Cin, H, W), dtype=jnp.float32)
    params = _make_params(k2, Cin, Cout)
    out = conv_layer_forward(x, *params)
    out = jax.block_until_ready(out)
    ref = reference_forward(x, *params)
    assert out.shape == (N, Cout, H, W)
    # bf16 matmul inputs -> looser tolerance than the pure-f32 path.
    assert jnp.allclose(out, ref, atol=2e-2, rtol=2e-2), "case 1 mismatch"

    # Case 2: multi-row-slab path (nT > 1), N=1, Cin=8, 20x20, Cout=16.
    N2, Cin2, H2, W2, Cout2 = 1, 8, 20, 20, 16
    x2 = jax.random.uniform(k3, (N2, Cin2, H2, W2), dtype=jnp.float32)
    params2 = _make_params(k4, Cin2, Cout2)
    out2 = conv_layer_forward(x2, *params2, tile_h=8)
    out2 = jax.block_until_ready(out2)
    ref2 = reference_forward(x2, *params2)
    assert out2.shape == (N2, Cout2, H2, W2)
    assert jnp.allclose(out2, ref2, atol=2e-2, rtol=2e-2), "case 2 mismatch"

    print("KERNEL_OK")
</pallas_src>

<mosaic_0001>
module attributes {stable_mosaic.version = 11 : i64} {
  func.func @conv_bn_lrelu_kernel(%arg0: i32, %arg1: i32, %arg2: memref<1x19x32x4xbf16, #tpu.memory_space<vmem>>, %arg3: memref<3x3x4x128xbf16, #tpu.memory_space<vmem>>, %arg4: memref<1x128xf32, #tpu.memory_space<vmem>>, %arg5: memref<1x128xf32, #tpu.memory_space<vmem>>, %arg6: memref<1x16x32x128xf32, #tpu.memory_space<vmem>>) attributes {dimension_semantics = [#tpu.dimension_semantics<parallel>, #tpu.dimension_semantics<parallel>], iteration_bounds = array<i64: 1, 2>, scalar_prefetch = 0 : i64, scratch_operands = 0 : i64, tpu.core_type = #tpu.core_type<tc>, window_params = [{transform_indices = @transform_0, window_bounds = array<i64: 1, 19, 32, 4>}, {transform_indices = @transform_1, window_bounds = array<i64: 3, 3, 4, 128>}, {transform_indices = @transform_2, window_bounds = array<i64: 1, 128>}, {transform_indices = @transform_3, window_bounds = array<i64: 1, 128>}, {transform_indices = @transform_4, window_bounds = array<i64: 1, 16, 32, 128>}]} {
    %c0 = arith.constant 0 : index
    %c0_0 = arith.constant 0 : index
    %c0_1 = arith.constant 0 : index
    %c0_2 = arith.constant 0 : index
    %0 = vector.load %arg2[%c0, %c0_0, %c0_1, %c0_2] : memref<1x19x32x4xbf16, #tpu.memory_space<vmem>>, vector<1x19x32x4xbf16>
    %1 = vector.shape_cast %0 : vector<1x19x32x4xbf16> to vector<19x32x4xbf16>
    %2 = vector.shape_cast %1 : vector<19x32x4xbf16> to vector<608x4xbf16>
    %3 = vector.extract_strided_slice %2 {offsets = [0, 0], sizes = [576, 4], strides = [1, 1]} : vector<608x4xbf16> to vector<576x4xbf16>
    %4 = vector.extract_strided_slice %2 {offsets = [1, 0], sizes = [576, 4], strides = [1, 1]} : vector<608x4xbf16> to vector<576x4xbf16>
    %5 = vector.extract_strided_slice %2 {offsets = [2, 0], sizes = [576, 4], strides = [1, 1]} : vector<608x4xbf16> to vector<576x4xbf16>
    %6 = vector.extract_strided_slice %3 {offsets = [0, 0], sizes = [512, 4], strides = [1, 1]} : vector<576x4xbf16> to vector<512x4xbf16>
    %c0_3 = arith.constant 0 : index
    %c0_4 = arith.constant 0 : index
    %c0_5 = arith.constant 0 : index
    %c0_6 = arith.constant 0 : index
    %7 = vector.load %arg3[%c0_3, %c0_4, %c0_5, %c0_6] : memref<3x3x4x128xbf16, #tpu.memory_space<vmem>>, vector<1x1x4x128xbf16>
    %8 = vector.shape_cast %7 : vector<1x1x4x128xbf16> to vector<4x128xbf16>
    %cst = arith.constant dense<0.000000e+00> : vector<512x128xf32>
    %9 = tpu.matmul %6, %8, %cst {dimension_numbers = #tpu.dot_dimension_numbers<[1], [0], [0], [1], [0, 0, 1, 1], [], []>} : vector<512x4xbf16>, vector<4x128xbf16>, vector<512x128xf32> -> vector<512x128xf32>
    %10 = vector.extract_strided_slice %4 {offsets = [0, 0], sizes = [512, 4], strides = [1, 1]} : vector<576x4xbf16> to vector<512x4xbf16>
    %c0_7 = arith.constant 0 : index
    %c1 = arith.constant 1 : index
    %c0_8 = arith.constant 0 : index
    %c0_9 = arith.constant 0 : index
    %11 = vector.load %arg3[%c0_7, %c1, %c0_8, %c0_9] : memref<3x3x4x128xbf16, #tpu.memory_space<vmem>>, vector<1x1x4x128xbf16>
    %12 = vector.shape_cast %11 : vector<1x1x4x128xbf16> to vector<4x128xbf16>
    %cst_10 = arith.constant dense<0.000000e+00> : vector<512x128xf32>
    %13 = tpu.matmul %10, %12, %cst_10 {dimension_numbers = #tpu.dot_dimension_numbers<[1], [0], [0], [1], [0, 0, 1, 1], [], []>} : vector<512x4xbf16>, vector<4x128xbf16>, vector<512x128xf32> -> vector<512x128xf32>
    %14 = arith.addf %9, %13 : vector<512x128xf32>
    %15 = vector.extract_strided_slice %5 {offsets = [0, 0], sizes = [512, 4], strides = [1, 1]} : vector<576x4xbf16> to vector<512x4xbf16>
    %c0_11 = arith.constant 0 : index
    %c2 = arith.constant 2 : index
    %c0_12 = arith.constant 0 : index
    %c0_13 = arith.constant 0 : index
    %16 = vector.load %arg3[%c0_11, %c2, %c0_12, %c0_13] : memref<3x3x4x128xbf16, #tpu.memory_space<vmem>>, vector<1x1x4x128xbf16>
    %17 = vector.shape_cast %16 : vector<1x1x4x128xbf16> to vector<4x128xbf16>
    %cst_14 = arith.constant dense<0.000000e+00> : vector<512x128xf32>
    %18 = tpu.matmul %15, %17, %cst_14 {dimension_numbers = #tpu.dot_dimension_numbers<[1], [0], [0], [1], [0, 0, 1, 1], [], []>} : vector<512x4xbf16>, vector<4x128xbf16>, vector<512x128xf32> -> vector<512x128xf32>
    %19 = arith.addf %14, %18 : vector<512x128xf32>
    %20 = vector.extract_strided_slice %3 {offsets = [32, 0], sizes = [512, 4], strides = [1, 1]} : vector<576x4xbf16> to vector<512x4xbf16>
    %c1_15 = arith.constant 1 : index
    %c0_16 = arith.constant 0 : index
    %c0_17 = arith.constant 0 : index
    %c0_18 = arith.constant 0 : index
    %21 = vector.load %arg3[%c1_15, %c0_16, %c0_17, %c0_18] : memref<3x3x4x128xbf16, #tpu.memory_space<vmem>>, vector<1x1x4x128xbf16>
    %22 = vector.shape_cast %21 : vector<1x1x4x128xbf16> to vector<4x128xbf16>
    %cst_19 = arith.constant dense<0.000000e+00> : vector<512x128xf32>
    %23 = tpu.matmul %20, %22, %cst_19 {dimension_numbers = #tpu.dot_dimension_numbers<[1], [0], [0], [1], [0, 0, 1, 1], [], []>} : vector<512x4xbf16>, vector<4x128xbf16>, vector<512x128xf32> -> vector<512x128xf32>
    %24 = arith.addf %19, %23 : vector<512x128xf32>
    %25 = vector.extract_strided_slice %4 {offsets = [32, 0], sizes = [512, 4], strides = [1, 1]} : vector<576x4xbf16> to vector<512x4xbf16>
    %c1_20 = arith.constant 1 : index
    %c1_21 = arith.constant 1 : index
    %c0_22 = arith.constant 0 : index
    %c0_23 = arith.constant 0 : index
    %26 = vector.load %arg3[%c1_20, %c1_21, %c0_22, %c0_23] : memref<3x3x4x128xbf16, #tpu.memory_space<vmem>>, vector<1x1x4x128xbf16>
    %27 = vector.shape_cast %26 : vector<1x1x4x128xbf16> to vector<4x128xbf16>
    %cst_24 = arith.constant dense<0.000000e+00> : vector<512x128xf32>
    %28 = tpu.matmul %25, %27, %cst_24 {dimension_numbers = #tpu.dot_dimension_numbers<[1], [0], [0], [1], [0, 0, 1, 1], [], []>} : vector<512x4xbf16>, vector<4x128xbf16>, vector<512x128xf32> -> vector<512x128xf32>
    %29 = arith.addf %24, %28 : vector<512x128xf32>
    %30 = vector.extract_strided_slice %5 {offsets = [32, 0], sizes = [512, 4], strides = [1, 1]} : vector<576x4xbf16> to vector<512x4xbf16>
    %c1_25 = arith.constant 1 : index
    %c2_26 = arith.constant 2 : index
    %c0_27 = arith.constant 0 : index
    %c0_28 = arith.constant 0 : index
    %31 = vector.load %arg3[%c1_25, %c2_26, %c0_27, %c0_28] : memref<3x3x4x128xbf16, #tpu.memory_space<vmem>>, vector<1x1x4x128xbf16>
    %32 = vector.shape_cast %31 : vector<1x1x4x128xbf16> to vector<4x128xbf16>
    %cst_29 = arith.constant dense<0.000000e+00> : vector<512x128xf32>
    %33 = tpu.matmul %30, %32, %cst_29 {dimension_numbers = #tpu.dot_dimension_numbers<[1], [0], [0], [1], [0, 0, 1, 1], [], []>} : vector<512x4xbf16>, vector<4x128xbf16>, vector<512x128xf32> -> vector<512x128xf32>
    %34 = arith.addf %29, %33 : vector<512x128xf32>
    %35 = vector.extract_strided_slice %3 {offsets = [64, 0], sizes = [512, 4], strides = [1, 1]} : vector<576x4xbf16> to vector<512x4xbf16>
    %c2_30 = arith.constant 2 : index
    %c0_31 = arith.constant 0 : index
    %c0_32 = arith.constant 0 : index
    %c0_33 = arith.constant 0 : index
    %36 = vector.load %arg3[%c2_30, %c0_31, %c0_32, %c0_33] : memref<3x3x4x128xbf16, #tpu.memory_space<vmem>>, vector<1x1x4x128xbf16>
    %37 = vector.shape_cast %36 : vector<1x1x4x128xbf16> to vector<4x128xbf16>
    %cst_34 = arith.constant dense<0.000000e+00> : vector<512x128xf32>
    %38 = tpu.matmul %35, %37, %cst_34 {dimension_numbers = #tpu.dot_dimension_numbers<[1], [0], [0], [1], [0, 0, 1, 1], [], []>} : vector<512x4xbf16>, vector<4x128xbf16>, vector<512x128xf32> -> vector<512x128xf32>
    %39 = arith.addf %34, %38 : vector<512x128xf32>
    %40 = vector.extract_strided_slice %4 {offsets = [64, 0], sizes = [512, 4], strides = [1, 1]} : vector<576x4xbf16> to vector<512x4xbf16>
    %c2_35 = arith.constant 2 : index
    %c1_36 = arith.constant 1 : index
    %c0_37 = arith.constant 0 : index
    %c0_38 = arith.constant 0 : index
    %41 = vector.load %arg3[%c2_35, %c1_36, %c0_37, %c0_38] : memref<3x3x4x128xbf16, #tpu.memory_space<vmem>>, vector<1x1x4x128xbf16>
    %42 = vector.shape_cast %41 : vector<1x1x4x128xbf16> to vector<4x128xbf16>
    %cst_39 = arith.constant dense<0.000000e+00> : vector<512x128xf32>
    %43 = tpu.matmul %40, %42, %cst_39 {dimension_numbers = #tpu.dot_dimension_numbers<[1], [0], [0], [1], [0, 0, 1, 1], [], []>} : vector<512x4xbf16>, vector<4x128xbf16>, vector<512x128xf32> -> vector<512x128xf32>
    %44 = arith.addf %39, %43 : vector<512x128xf32>
    %45 = vector.extract_strided_slice %5 {offsets = [64, 0], sizes = [512, 4], strides = [1, 1]} : vector<576x4xbf16> to vector<512x4xbf16>
    %c2_40 = arith.constant 2 : index
    %c2_41 = arith.constant 2 : index
    %c0_42 = arith.constant 0 : index
    %c0_43 = arith.constant 0 : index
    %46 = vector.load %arg3[%c2_40, %c2_41, %c0_42, %c0_43] : memref<3x3x4x128xbf16, #tpu.memory_space<vmem>>, vector<1x1x4x128xbf16>
    %47 = vector.shape_cast %46 : vector<1x1x4x128xbf16> to vector<4x128xbf16>
    %cst_44 = arith.constant dense<0.000000e+00> : vector<512x128xf32>
    %48 = tpu.matmul %45, %47, %cst_44 {dimension_numbers = #tpu.dot_dimension_numbers<[1], [0], [0], [1], [0, 0, 1, 1], [], []>} : vector<512x4xbf16>, vector<4x128xbf16>, vector<512x128xf32> -> vector<512x128xf32>
    %49 = arith.addf %44, %48 : vector<512x128xf32>
    %c0_45 = arith.constant 0 : index
    %c0_46 = arith.constant 0 : index
    %50 = vector.load %arg4[%c0_45, %c0_46] : memref<1x128xf32, #tpu.memory_space<vmem>>, vector<1x128xf32>
    %51 = vector.broadcast %50 : vector<1x128xf32> to vector<512x128xf32>
    %52 = arith.mulf %49, %51 : vector<512x128xf32>
    %c0_47 = arith.constant 0 : index
    %c0_48 = arith.constant 0 : index
    %53 = vector.load %arg5[%c0_47, %c0_48] : memref<1x128xf32, #tpu.memory_space<vmem>>, vector<1x128xf32>
    %54 = vector.broadcast %53 : vector<1x128xf32> to vector<512x128xf32>
    %55 = arith.addf %52, %54 : vector<512x128xf32>
    %cst_49 = arith.constant 0.00999999977 : f32
    %56 = vector.broadcast %cst_49 : f32 to vector<512x128xf32>
    %57 = arith.mulf %56, %55 : vector<512x128xf32>
    %58 = arith.maximumf %55, %57 : vector<512x128xf32>
    %59 = vector.shape_cast %58 : vector<512x128xf32> to vector<16x32x128xf32>
    %c0_50 = arith.constant 0 : index
    %c0_51 = arith.constant 0 : index
    %c0_52 = arith.constant 0 : index
    %c0_53 = arith.constant 0 : index
    %60 = vector.load %arg6[%c0_50, %c0_51, %c0_52, %c0_53] : memref<1x16x32x128xf32, #tpu.memory_space<vmem>>, vector<1x16x32x128xf32>
    %61 = vector.shape_cast %60 : vector<1x16x32x128xf32> to vector<16x32x128xf32>
    %62 = vector.shape_cast %59 : vector<16x32x128xf32> to vector<1x16x32x128xf32>
    tpu.vector_store %arg6[%c0_50, %c0_51, %c0_52, %c0_53], %62 {strides = array<i32>} : memref<1x16x32x128xf32, #tpu.memory_space<vmem>>, vector<1x16x32x128xf32>,
    return
  }
  func.func @transform_0(%arg0: i32, %arg1: i32) -> (i32, i32, i32, i32) {
    %c0_i32 = arith.constant 0 : i32
    %c0_i32_0 = arith.constant 0 : i32
    %c0_i32_1 = arith.constant 0 : i32
    %c0_i32_2 = arith.constant 0 : i32
    return %arg1, %c0_i32, %c0_i32_0, %c0_i32_1 : i32, i32, i32, i32
  }
  func.func @transform_1(%arg0: i32, %arg1: i32) -> (i32, i32, i32, i32) {
    %c0_i32 = arith.constant 0 : i32
    %c0_i32_0 = arith.constant 0 : i32
    %c0_i32_1 = arith.constant 0 : i32
    %c0_i32_2 = arith.constant 0 : i32
    return %c0_i32, %c0_i32_0, %c0_i32_1, %arg0 : i32, i32, i32, i32
  }
  func.func @transform_2(%arg0: i32, %arg1: i32) -> (i32, i32) {
    %c0_i32 = arith.constant 0 : i32
    %c0_i32_0 = arith.constant 0 : i32
    return %c0_i32, %arg0 : i32, i32
  }
  func.func @transform_3(%arg0: i32, %arg1: i32) -> (i32, i32) {
    %c0_i32 = arith.constant 0 : i32
    %c0_i32_0 = arith.constant 0 : i32
    return %c0_i32, %arg0 : i32, i32
  }
  func.func @transform_4(%arg0: i32, %arg1: i32) -> (i32, i32, i32, i32) {
    %c0_i32 = arith.constant 0 : i32
    %c0_i32_0 = arith.constant 0 : i32
    %c0_i32_1 = arith.constant 0 : i32
    return %arg1, %c0_i32, %c0_i32_0, %arg0 : i32, i32, i32, i32
  }
}

</mosaic_0001>

<bundles_post_ra>
// kernel: conv_layer_forward.1
= control target key start
LH: loop header
LB: loop body
LE: loop exit
PB: predicated region body
PF: predicated region fallthrough
CT: control target
= control target key end

     0   :  { %s6634_s15 = smov 0   ;;  %s6636_s16 = smov 0   ;;  %s8044_s0 = inlined_call_operand.vmem [shape: bf16[2,19,32,4], index: 0, kind: input, shape index: {}]   ;;  %s8045_s1 = inlined_call_operand.vmem [shape: bf16[3,3,4,128], index: 1, kind: input, shape index: {}]   ;;  %s8046_s2 = inlined_call_operand.vmem [shape: f32[1,128], index: 2, kind: input, shape index: {}]   ;;  %s8047_s3 = inlined_call_operand.vmem [shape: f32[1,128], index: 3, kind: input, shape index: {}]   ;;  %s8048_s4 = inlined_call_operand.vmem [shape: f32[2,16,32,128], index: 4, kind: output, shape index: {}]  }
   0x1   :  { %s6638_s17 = smov 0  }
   0x2 LB: > { %s23_s18 = sadd.s32 1, %s6603_s16  ;;  %p4756_p0 = scmp.ge.s32.totalorder %s6607_s17, 1  ;;  %s6607_s17 = sphi %s6638_s17, %s14_s17   ;;  %s6603_s16 = sphi %s6636_s16, %s8222_s16   ;;  %s6599_s15 = sphi %s6634_s15, %s8221_s15  }
   0x3   : > { %p24_p1 = scmp.ge.s32.totalorder %s23_s18, 2  ;;  %p201_p2 = scmp.lt.s32.totalorder %s6607_s17, 3 }
   0x5   : > { %s8224_s18 = smov (%p24_p1, %s23_s18), 0  ;;  %p202_p3 = pnand %p4756_p0, %p201_p2 }
   0x7   : > { %205 = sbr.rel (%p202_p3) target bundleno = 825 (0x339), region = 36 }
   0xe   : > { %v4760_v0 = vld [vmem:[%s8045_s1 + $0x2] sm:$0x3]  ;;  %vm861_vm0 = vcmask 1041408   ;;  %v6658_v1 = vld [vmem:[%s8045_s1 + $0x8] sm:$0x3]  ;;  %p240_p4 = scmp.lt.s32.totalorder %s6599_s15, 1 }
   0xf   : > { %6505 = vmatprep.subr.msk.bf16.mxu1 %vm861_vm0, %v4760_v0  ;;  %6509 = vmatprep.subr.msk.bf16.mxu0 %vm861_vm0, %v6658_v1  ;;  %v863_v2 = vsel %vm861_vm0, %v4760_v0, 0  ;;  %v6666_v3 = vsel %vm861_vm0, %v6658_v1, 0  ;;  %v337_v4 = vld [vmem:[%s8045_s1] sm:$0x3]  ;;  %v4960_v5 = vld [vmem:[%s8045_s1 + $0xa] sm:$0x3] }
  0x10   : > { %8118 = vst [vmem:[#allocation2_spill] sm:$0xff] %v6666_v3  ;;  %5398 = vmatpush3.bf16.msra.mxu1 %v863_v2  ;;  %5662 = vmatpush3.bf16.msra.mxu0 %v6666_v3  ;;  %s8226_s15 = smov (!%p240_p4, %s6599_s15), 1  ;;  %vm503_vm1 = vsmask.f32 7424  ;;  %vm764_vm2 = vcmask 31744   ;;  %v1219_v31 = vsel %vm861_vm0, %v337_v4, 0 }
  0x11   : > { %6506 = vmatprep.subr.msk.bf16.mxu1 %vm861_vm0, %v337_v4  ;;  %6511 = vmatprep.subr.msk.bf16.mxu0 %vm861_vm0, %v4960_v5  ;;  %s6515_s27 = smul.u32 304, %s8226_s15  ;;  %v2809_v38 = vsel %vm861_vm0, %v4960_v5, 0  ;;  %v6740_v47 = vld [vmem:[%s8045_s1 + $0xc] sm:$0x3]  ;;  %vm1512_vm3 = vcmask 1046528   ;;  %s5099_s23 = sshll.u32 %s8226_s15, 9 }
  0x12   : > { %s7823_s26 = scalar_lea.vmem %s8048_s4, %s5099_s23 }
  0x13   : > { %s6683_s30 = scalar_lea.vmem %s8044_s0, %s6515_s27 }
  0x14   : > { %v6686_v6 = vld [vmem:[%s6683_s30] sm:$0xff]   ;;  %v6689_v7 = vld [vmem:[%s6683_s30 + $0x8] sm:$0xff]   ;;  %v6696_v12 = vld [vmem:[%s6683_s30 + $0x10] sm:$0xff]  }
  0x15   : > { %v505_v8 = vshrl.u32 %v6686_v6, 16  ;;  %v507_v9 = vshll.u32 %v6686_v6, 16  ;;  %v512_v10 = vshll.u32 %v6689_v7, 16  ;;  %v516_v11 = vshrl.u32 %v6689_v7, 16  ;;  %v6699_v13 = vld [vmem:[%s6683_s30 + $0x18] sm:$0xff]   ;;  %v6702_v16 = vld [vmem:[%s6683_s30 + $0x20] sm:$0xff]  }
  0x16   : > { %v6705_v17 = vld [vmem:[%s6683_s30 + $0x28] sm:$0xff]   ;;  %v520_v18 = vshll.u32 %v6696_v12, 16  ;;  %v524_v19 = vshrl.u32 %v6696_v12, 16  ;;  %v528_v20 = vshll.u32 %v6699_v13, 16  ;;  %v532_v21 = vshrl.u32 %v6699_v13, 16  ;;  %v6715_v29 = vld [vmem:[%s6683_s30 + $0x30] sm:$0xff]  }
  0x17   : > { %v509_v14 = vrot.slane %v507_v9, 1  ;;  %v514_v15 = vrot.slane %v512_v10, 1  ;;  %v536_v24 = vshll.u32 %v6702_v16, 16  ;;  %v540_v25 = vshrl.u32 %v6702_v16, 16  ;;  %v6722_v37 = vld [vmem:[%s6683_s30 + $0x38] sm:$0xff]   ;;  %v6744_v49 = vld [vmem:[%s6683_s30 + $0x40] sm:$0xff]  }
  0x18   : > { %v522_v26 = vrot.slane %v520_v18, 1  ;;  %v530_v27 = vrot.slane %v528_v20, 1  ;;  %v544_v28 = vshll.u32 %v6705_v17, 16  ;;  %v548_v40 = vshrl.u32 %v6705_v17, 16  ;;  %v6749_v53 = vld [vmem:[%s6683_s30 + $0x48] sm:$0xff]   ;;  %v6769_v61 = vld [vmem:[%s6683_s30 + $0x50] sm:$0xff]  }
  0x19   : > { %v510_v22 = vor.u32 %v509_v14, %v505_v8  ;;  %v518_v23 = vor.u32 %v516_v11, %v514_v15  ;;  %v538_v32 = vrot.slane %v536_v24, 1  ;;  %v552_v41 = vshll.u32 %v6715_v29, 16  ;;  %v6774_v2 = vld [vmem:[%s6683_s30 + $0x58] sm:$0xff]  }
  0x1a   : > { %v526_v33 = vor.u32 %v524_v19, %v522_v26  ;;  %v534_v34 = vor.u32 %v532_v21, %v530_v27  ;;  %v546_v36 = vrot.slane %v544_v28, 1  ;;  %v556_v44 = vshrl.u32 %v6715_v29, 16  ;;  %v6798_v21 = vld [vmem:[%s6683_s30 + $0x68] sm:$0xff]  }
  0x1b   : > { %v515_v30 = vsel %vm503_vm1, %v510_v22, %v514_v15  ;;  %v523_v35 = vsel %vm503_vm1, %v518_v23, %v522_v26  ;;  %v542_v39 = vor.u32 %v540_v25, %v538_v32  ;;  %v560_v45 = vshll.u32 %v6722_v37, 16  ;;  %v6793_v15 = vld [vmem:[%s6683_s30 + $0x60] sm:$0xff]  }
  0x1c   : > { %5399 = vmatprep.mubr.msk.bf16.mxu1 %vm764_vm2, %v515_v30  ;;  %v531_v42 = vsel %vm503_vm1, %v526_v33, %v530_v27  ;;  %v539_v43 = vsel %vm503_vm1, %v534_v34, %v538_v32  ;;  %v554_v48 = vrot.slane %v552_v41, 1  ;;  %v550_v50 = vor.u32 %v548_v40, %v546_v36  ;;  %v6817_v30 = vld [vmem:[%s6683_s30 + $0x70] sm:$0xff]   ;;  %v6822_v34 = vld [vmem:[%s6683_s30 + $0x78] sm:$0xff]  }
  0x1d   : > { %5400 = vmatmul.mubr.msk.bf16.vlgmr.msra.gmra.mrb[0].mxu1 %vm764_vm2, %v523_v35  ;;  %5663 = vmatprep.mubr.msk.bf16.mxu0 %vm764_vm2, %v531_v42  ;;  %v6735_v46 = vsel %vm503_vm1, %v542_v39, %v546_v36  ;;  %v562_v52 = vrot.slane %v560_v45, 1  ;;  %v568_v54 = vshll.u32 %v6744_v49, 16  ;;  %v564_v56 = vshrl.u32 %v6722_v37, 16  ;;  %v6834_v39 = vld [vmem:[%s8045_s1 + $0x4] sm:$0x3] }
  0x1e   : > { %5464 = vmatpush3.bf16.msra.mxu1 %v1219_v31  ;;  %5403 = vmatprep.mubr.msk.bf16.mxu1 %vm764_vm2, %v531_v42  ;;  %8119 = vst [vmem:[#allocation3_spill] sm:$0xff] %v6735_v46  ;;  %v558_v51 = vor.u32 %v556_v44, %v554_v48  ;;  %v6756_v55 = vsel %vm503_vm1, %v550_v50, %v554_v48  ;;  %v572_v58 = vshrl.u32 %v6744_v49, 16  ;;  %v576_v59 = vshll.u32 %v6749_v53, 16  ;;  %v6848_v44 = vld [vmem:[%s6683_s30 + $0x80] sm:$0xff]  }
  0x1f   : > { %5664 = vmatmul.mubr.msk.bf16.vlgmr.msra.gmra.mrb[0].mxu0 %vm764_vm2, %v539_v43  ;;  %8120 = vst [vmem:[#allocation4_spill] sm:$0xff] %v6756_v55  ;;  %v570_v60 = vrot.slane %v568_v54, 1  ;;  %v566_v62 = vor.u32 %v564_v56, %v562_v52  ;;  %v584_v4 = vshll.u32 %v6769_v61, 16  ;;  %v580_v8 = vshrl.u32 %v6749_v53, 16  ;;  %6507 = vmatprep.subr.msk.bf16.mxu1 %vm861_vm0, %v6834_v39 }
  0x20   : > { %5728 = vmatpush3.bf16.msra.mxu0 %v2809_v38  ;;  %5667 = vmatprep.mubr.msk.bf16.mxu0 %vm764_vm2, %v6735_v46  ;;  %v6762_v57 = vsel %vm503_vm1, %v558_v51, %v562_v52  ;;  %v578_v0 = vrot.slane %v576_v59, 1  ;;  %v588_v10 = vshrl.u32 %v6769_v61, 16  ;;  %v592_v11 = vshll.u32 %v6774_v2, 16  ;;  %v6853_v51 = vld [vmem:[%s6683_s30 + $0x88] sm:$0xff]  }
  0x21   : > { %6512 = vmatprep.subr.msk.bf16.mxu0 %vm861_vm0, %v6740_v47  ;;  %8121 = vst [vmem:[#allocation5_spill] sm:$0xff] %v6762_v57  ;;  %v574_v63 = vor.u32 %v572_v58, %v570_v60  ;;  %v6780_v5 = vsel %vm503_vm1, %v566_v62, %v570_v60  ;;  %v586_v14 = vrot.slane %v584_v4, 1  ;;  %v600_v22 = vshll.u32 %v6793_v15, 16 }
  0x22   : > { %8122 = vst [vmem:[#allocation6_spill] sm:$0xff] %v6780_v5  ;;  %v582_v18 = vor.u32 %v580_v8, %v578_v0  ;;  %v594_v20 = vrot.slane %v592_v11, 1  ;;  %v596_v24 = vshrl.u32 %v6774_v2, 16  ;;  %v604_v26 = vshrl.u32 %v6793_v15, 16 }
  0x23   : > { %v6786_v9 = vsel %vm503_vm1, %v574_v63, %v578_v0  ;;  %v590_v19 = vor.u32 %v588_v10, %v586_v14  ;;  %v608_v27 = vshll.u32 %v6798_v21, 16  ;;  %v602_v28 = vrot.slane %v600_v22, 1  ;;  %v6874_v0 = vld [vmem:[%s6683_s30 + $0x90] sm:$0xff]  }
  0x24   : > { %8123 = vst [vmem:[#allocation7_spill] sm:$0xff] %v6786_v9  ;;  %v6804_v23 = vsel %vm503_vm1, %v582_v18, %v586_v14  ;;  %v598_v31 = vor.u32 %v596_v24, %v594_v20  ;;  %v616_v35 = vshll.u32 %v6817_v30, 16  ;;  %v612_v38 = vshrl.u32 %v6798_v21, 16 }
  0x25   : > { %5404 = vmatmul.mubr.msk.bf16.gmra.mrb[4].mxu1 %vm764_vm2, %v539_v43  ;;  %8124 = vst [vmem:[#allocation8_spill] sm:$0xff] %v6804_v23  ;;  %v6810_v25 = vsel %vm503_vm1, %v590_v19, %v594_v20  ;;  %v606_v32 = vor.u32 %v604_v26, %v602_v28  ;;  %v610_v33 = vrot.slane %v608_v27, 1  ;;  %v620_v41 = vshrl.u32 %v6817_v30, 16  ;;  %v6889_v19 = vld [vmem:[%s6683_s30 + $0x98] sm:$0xff]  }
  0x26   : > { %5407 = vmatprep.mubr.msk.bf16.mxu1 %vm764_vm2, %v6735_v46  ;;  %8125 = vst [vmem:[#allocation9_spill] sm:$0xff] %v6810_v25  ;;  %v6828_v36 = vsel %vm503_vm1, %v598_v31, %v602_v28  ;;  %v624_v42 = vshll.u32 %v6822_v34, 16  ;;  %v618_v43 = vrot.slane %v616_v35, 1  ;;  %v632_v52 = vshll.u32 %v6848_v44, 16 }
  0x27   : > { %5668 = vmatmul.mubr.msk.bf16.gmra.mrb[4].mxu0 %vm764_vm2, %v6756_v55  ;;  %8126 = vst [vmem:[#allocation10_spill] sm:$0xff] %v6828_v36  ;;  %v6839_v40 = vsel %vm503_vm1, %v606_v32, %v610_v33  ;;  %v614_v45 = vor.u32 %v612_v38, %v610_v33  ;;  %v628_v56 = vshrl.u32 %v6822_v34, 16  ;;  %v636_v59 = vshrl.u32 %v6848_v44, 16  ;;  %v6905_v32 = vld [vmem:[%s6683_s30 + $0xa0] sm:$0xff]  }
  0x28   : > { %5671 = vmatprep.mubr.msk.bf16.mxu0 %vm764_vm2, %v6762_v57  ;;  %8127 = vst [vmem:[#allocation11_spill] sm:$0xff] %v6839_v40  ;;  %v622_v48 = vor.u32 %v620_v41, %v618_v43  ;;  %v626_v50 = vrot.slane %v624_v42, 1  ;;  %v640_v60 = vshll.u32 %v6853_v51, 16  ;;  %v634_v62 = vrot.slane %v632_v52, 1  ;;  %v6915_v41 = vld [vmem:[%s6683_s30 + $0xa8] sm:$0xff]  }
  0x29   : > { %v6859_v54 = vsel %vm503_vm1, %v614_v45, %v618_v43  ;;  %v644_v11 = vshrl.u32 %v6853_v51, 16  ;;  %v648_v14 = vshll.u32 %v6874_v0, 16  ;;  %v8049_v24 = vrot.slane %v6696_v12, 1 }
  0x2a   : > { %8128 = vst [vmem:[#allocation12_spill] sm:$0xff] %v6859_v54  ;;  %v6865_v58 = vsel %vm503_vm1, %v622_v48, %v626_v50  ;;  %v630_v63 = vor.u32 %v628_v56, %v626_v50  ;;  %v638_v4 = vor.u32 %v636_v59, %v634_v62  ;;  %v642_v8 = vrot.slane %v640_v60, 1 }
  0x2b   : > { %8129 = vst [vmem:[#allocation13_spill] sm:$0xff] %v6865_v58  ;;  %v650_v22 = vrot.slane %v648_v14, 1  ;;  %v1518_v26 = vrot.slane %v6699_v13, 1  ;;  %v652_v27 = vshrl.u32 %v6874_v0, 16  ;;  %v656_v28 = vshll.u32 %v6889_v19, 16 }
  0x2c   : > { %v6879_v10 = vsel %vm503_vm1, %v630_v63, %v634_v62  ;;  %v6886_v18 = vsel %vm503_vm1, %v638_v4, %v642_v8  ;;  %v646_v20 = vor.u32 %v644_v11, %v642_v8  ;;  %v1520_v42 = vrot.slane %v6702_v16, 1  ;;  %v6936_v62 = vld [vmem:[%s6683_s30 + $0xb0] sm:$0xff]  }
  0x2d   : > { %5408 = vmatmul.mubr.msk.bf16.gmra.mrb[8].mxu1 %vm764_vm2, %v6756_v55  ;;  %8130 = vst [vmem:[#allocation14_spill] sm:$0xff] %v6879_v10  ;;  %8131 = vst [vmem:[#allocation15_spill] sm:$0xff] %v6886_v18  ;;  %v6912_v33 = vsel %vm1512_vm3, %v8049_v24, %v1518_v26  ;;  %v654_v35 = vor.u32 %v652_v27, %v650_v22  ;;  %v658_v38 = vrot.slane %v656_v28, 1  ;;  %v664_v43 = vshll.u32 %v6905_v32, 16  ;;  %v6985_v24 = vld [vmem:[%s6683_s30 + $0xc8] sm:$0xff]  }
  0x2e   : > { %5411 = vmatprep.mubr.msk.bf16.mxu1 %vm764_vm2, %v6762_v57  ;;  %v6902_v31 = vsel %vm503_vm1, %v646_v20, %v650_v22  ;;  %v1522_v45 = vrot.slane %v6705_v17, 1  ;;  %v660_v48 = vshrl.u32 %v6889_v19, 16  ;;  %v668_v52 = vshrl.u32 %v6905_v32, 16  ;;  %v6946_v20 = vld [vmem:[%s6683_s30 + $0xb8] sm:$0xff]   ;;  %v6951_v22 = vld [vmem:[%s8045_s1 + $0xe] sm:$0x3] }
  0x2f   : > { %5672 = vmatmul.mubr.msk.bf16.gmra.mrb[8].mxu0 %vm764_vm2, %v6780_v5  ;;  %8132 = vst [vmem:[#allocation16_spill] sm:$0xff] %v6902_v31  ;;  %v6926_v50 = vsel %vm503_vm1, %v654_v35, %v658_v38  ;;  %v672_v56 = vshll.u32 %v6915_v41, 16  ;;  %v6933_v59 = vsel %vm1512_vm3, %v1518_v26, %v1520_v42  ;;  %v666_v60 = vrot.slane %v664_v43, 1 }
  0x30   : > { %5675 = vmatprep.mubr.msk.bf16.mxu0 %vm764_vm2, %v6786_v9  ;;  %8133 = vst [vmem:[#allocation17_spill] sm:$0xff] %v6926_v50  ;;  %v3181_v63 = vsel %vm861_vm0, %v6740_v47, 0  ;;  %v6943_v4 = vsel %vm1512_vm3, %v1520_v42, %v1522_v45  ;;  %v662_v8 = vor.u32 %v660_v48, %v658_v38  ;;  %v1524_v47 = vrot.slane %v6715_v29, 1 }
  0x31   : > { %v670_v11 = vor.u32 %v668_v52, %v666_v60  ;;  %v674_v14 = vrot.slane %v672_v56, 1  ;;  %v680_v26 = vshll.u32 %v6936_v62, 16  ;;  %v1526_v28 = vrot.slane %v6722_v37, 1  ;;  %v6977_v56 = vld [vmem:[%s6683_s30 + $0xc0] sm:$0xff]  }
  0x32   : > { %v6960_v27 = vsel %vm503_vm1, %v662_v8, %v666_v60  ;;  %v676_v35 = vshrl.u32 %v6915_v41, 16  ;;  %v684_v42 = vshrl.u32 %v6936_v62, 16  ;;  %v688_v43 = vshll.u32 %v6946_v20, 16 }
  0x33   : > { %8134 = vst [vmem:[#allocation18_spill] sm:$0xff] %v6960_v27  ;;  %v6967_v38 = vsel %vm503_vm1, %v670_v11, %v674_v14  ;;  %v6974_v48 = vsel %vm1512_vm3, %v1522_v45, %v1524_v47  ;;  %v682_v52 = vrot.slane %v680_v26, 1  ;;  %v6982_v60 = vsel %vm1512_vm3, %v1524_v47, %v1526_v28 }
  0x34   : > { %8135 = vst [vmem:[#allocation19_spill] sm:$0xff] %v6967_v38  ;;  %v690_v11 = vrot.slane %v688_v43, 1  ;;  %v1528_v45 = vrot.slane %v6744_v49, 1  ;;  %v696_v26 = vshll.u32 %v6977_v56, 16  ;;  %v700_v43 = vshrl.u32 %v6977_v56, 16 }
  0x35   : > { %5412 = vmatmul.mubr.msk.bf16.gmra.mrb[12].mxu1 %vm764_vm2, %v6780_v5  ;;  %v686_v8 = vor.u32 %v684_v42, %v682_v52  ;;  %v704_v3 = vshll.u32 %v6985_v24, 16 }
  0x36   : > { %5415 = vmatprep.mubr.msk.bf16.mxu1 %vm764_vm2, %v6786_v9  ;;  %v7081_v9 = vld [vmem:[%s6683_s30 + $0xf8] sm:$0xff]  }
  0x37   : > { %5676 = vmatmul.mubr.msk.bf16.gmra.mrb[12].mxu0 %vm764_vm2, %v6804_v23  ;;  %v6999_v42 = vsel %vm503_vm1, %v686_v8, %v690_v11 }
  0x38   : > { %5679 = vmatprep.mubr.msk.bf16.mxu0 %vm764_vm2, %v6810_v25  ;;  %8137 = vst [vmem:[#allocation21_spill] sm:$0xff] %v6999_v42 }
  0x3d   : > { %5416 = vmatmul.mubr.msk.bf16.gmra.mrb[16].mxu1 %vm764_vm2, %v6804_v23 }
  0x3e   : > { %5419 = vmatprep.mubr.msk.bf16.mxu1 %vm764_vm2, %v6810_v25 }
  0x3f   : > { %5680 = vmatmul.mubr.msk.bf16.gmra.mrb[16].mxu0 %vm764_vm2, %v6828_v36 }
  0x40   : > { %5683 = vmatprep.mubr.msk.bf16.mxu0 %vm764_vm2, %v6839_v40 }
  0x45   : > { %5420 = vmatmul.mubr.msk.bf16.gmra.mrb[20].mxu1 %vm764_vm2, %v6828_v36 }
  0x46   : > { %5423 = vmatprep.mubr.msk.bf16.mxu1 %vm764_vm2, %v6839_v40  ;;  %v7049_v40 = vld [vmem:[%s6683_s30 + $0xe8] sm:$0xff]  }
  0x47   : > { %5684 = vmatmul.mubr.msk.bf16.gmra.mrb[20].mxu0 %vm764_vm2, %v6859_v54 }
  0x48   : > { %5687 = vmatprep.mubr.msk.bf16.mxu0 %vm764_vm2, %v6865_v58 }
  0x4d   : > { %5424 = vmatmul.mubr.msk.bf16.gmra.mrb[24].mxu1 %vm764_vm2, %v6859_v54 }
  0x4e   : > { %5427 = vmatprep.mubr.msk.bf16.mxu1 %vm764_vm2, %v6865_v58 }
  0x4f   : > { %5688 = vmatmul.mubr.msk.bf16.gmra.mrb[24].mxu0 %vm764_vm2, %v6879_v10 }
  0x50   : > { %5691 = vmatprep.mubr.msk.bf16.mxu0 %vm764_vm2, %v6886_v18 }
  0x55   : > { %5428 = vmatmul.mubr.msk.bf16.gmra.mrb[28].mxu1 %vm764_vm2, %v6879_v10 }
  0x56   : > { %5431 = vmatprep.mubr.msk.bf16.mxu1 %vm764_vm2, %v6886_v18  ;;  %v7017_v18 = vld [vmem:[%s6683_s30 + $0xd8] sm:$0xff]  }
  0x57   : > { %5692 = vmatmul.mubr.msk.bf16.gmra.mrb[28].mxu0 %vm764_vm2, %v6902_v31 }
  0x58   : > { %5729 = vmatprep.mubr.msk.bf16.mxu0 %vm764_vm2, %v6912_v33 }
  0x5d   : > { %5432 = vmatmul.mubr.msk.bf16.gmra.mrb[32].mxu1 %vm764_vm2, %v6902_v31  ;;  %v706_v31 = vrot.slane %v704_v3, 1  ;;  %v708_v3 = vshrl.u32 %v6985_v24, 16 }
  0x5e   : > { %5435 = vmatprep.mubr.msk.bf16.mxu1 %vm764_vm2, %v6926_v50 }
  0x5f   : > { %5730 = vmatmul.mubr.msk.bf16.vlgmr.msra.gmra.mrb[0].mxu0 %vm764_vm2, %v6933_v59 }
  0x60   : > { %5794 = vmatpush3.bf16.msra.mxu0 %v3181_v63  ;;  %5733 = vmatprep.mubr.msk.bf16.mxu0 %vm764_vm2, %v6943_v4  ;;  %v678_v63 = vor.u32 %v676_v35, %v674_v14  ;;  %v1530_v14 = vrot.slane %v6749_v53, 1  ;;  %v692_v35 = vshrl.u32 %v6946_v20, 16 }
  0x61   : > { %6513 = vmatprep.subr.msk.bf16.mxu0 %vm861_vm0, %v6951_v22 }
  0x62   : > { %v6994_v47 = vsel %vm503_vm1, %v678_v63, %v682_v52  ;;  %v7009_v52 = vld [vmem:[%s6683_s30 + $0xd0] sm:$0xff]   ;;  %v7014_v63 = vsel %vm1512_vm3, %v1528_v45, %v1530_v14  ;;  %v694_v8 = vor.u32 %v692_v35, %v690_v11  ;;  %v1534_v11 = vrot.slane %v6774_v2, 1 }
  0x63   : > { %8136 = vst [vmem:[#allocation20_spill] sm:$0xff] %v6994_v47 }
  0x65   : > { %5436 = vmatmul.mubr.msk.bf16.gmra.mrb[36].mxu1 %vm764_vm2, %v6960_v27  ;;  %v698_v27 = vrot.slane %v696_v26, 1  ;;  %v712_v26 = vshll.u32 %v7009_v52, 16 }
  0x66   : > { %5439 = vmatprep.mubr.msk.bf16.mxu1 %vm764_vm2, %v6967_v38  ;;  %v7006_v38 = vsel %vm1512_vm3, %v1526_v28, %v1528_v45  ;;  %v1532_v28 = vrot.slane %v6769_v61, 1 }
  0x67   : > { %5734 = vmatmul.mubr.msk.bf16.gmra.mrb[4].mxu0 %vm764_vm2, %v6974_v48  ;;  %v702_v50 = vor.u32 %v700_v43, %v698_v27  ;;  %v7026_v45 = vsel %vm503_vm1, %v694_v8, %v698_v27  ;;  %v716_v43 = vshrl.u32 %v7009_v52, 16  ;;  %v714_v10 = vrot.slane %v712_v26, 1  ;;  %v7041_v27 = vld [vmem:[%s6683_s30 + $0xe0] sm:$0xff]  }
  0x68   : > { %5737 = vmatprep.mubr.msk.bf16.mxu0 %vm764_vm2, %v6982_v60  ;;  %8138 = vst [vmem:[#allocation22_spill] sm:$0xff] %v7026_v45  ;;  %v7046_v8 = vsel %vm1512_vm3, %v1532_v28, %v1534_v11  ;;  %v728_v26 = vshll.u32 %v7041_v27, 16 }
  0x69   : > { %v7031_v35 = vsel %vm503_vm1, %v702_v50, %v706_v31  ;;  %v710_v50 = vor.u32 %v708_v3, %v706_v31  ;;  %v718_v58 = vor.u32 %v716_v43, %v714_v10  ;;  %v1538_v31 = vrot.slane %v6798_v21, 1 }
  0x6a   : > { %8139 = vst [vmem:[#allocation23_spill] sm:$0xff] %v7031_v35  ;;  %v732_v43 = vshrl.u32 %v7041_v27, 16  ;;  %v730_v36 = vrot.slane %v728_v26, 1 }
  0x6c   : > { %v734_v25 = vor.u32 %v732_v43, %v730_v36  ;;  %v752_v43 = vshll.u32 %v7081_v9, 16 }
  0x6d   : > { %5440 = vmatmul.mubr.msk.bf16.gmra.mrb[40].mxu1 %vm764_vm2, %v6994_v47  ;;  %v7038_v47 = vsel %vm1512_vm3, %v1530_v14, %v1532_v28  ;;  %v1536_v14 = vrot.slane %v6793_v15, 1  ;;  %v7058_v28 = vsel %vm503_vm1, %v710_v50, %v714_v10  ;;  %v7073_v10 = vld [vmem:[%s6683_s30 + $0xf0] sm:$0xff]  }
  0x6e   : > { %5443 = vmatprep.mubr.msk.bf16.mxu1 %vm764_vm2, %v6999_v42  ;;  %v720_v42 = vshll.u32 %v7017_v18, 16  ;;  %8140 = vst [vmem:[#allocation24_spill] sm:$0xff] %v7058_v28  ;;  %v744_v26 = vshll.u32 %v7073_v10, 16  ;;  %v754_v46 = vrot.slane %v752_v43, 1 }
  0x6f   : > { %5738 = vmatmul.mubr.msk.bf16.gmra.mrb[8].mxu0 %vm764_vm2, %v7006_v38 }
  0x70   : > { %5741 = vmatprep.mubr.msk.bf16.mxu0 %vm764_vm2, %v7014_v63  ;;  %v722_v54 = vrot.slane %v720_v42, 1  ;;  %v724_v42 = vshrl.u32 %v7017_v18, 16 }
  0x72   : > { %v7063_v3 = vsel %vm503_vm1, %v718_v58, %v722_v54  ;;  %v7078_v58 = vsel %vm1512_vm3, %v1536_v14, %v1538_v31  ;;  %v726_v50 = vor.u32 %v724_v42, %v722_v54  ;;  %v740_v54 = vshrl.u32 %v7049_v40, 16 }
  0x73   : > { %8141 = vst [vmem:[#allocation25_spill] sm:$0xff] %v7063_v3  ;;  %v748_v42 = vshrl.u32 %v7073_v10, 16 }
  0x75   : > { %5444 = vmatmul.mubr.msk.bf16.gmra.mrb[44].mxu1 %vm764_vm2, %v7026_v45  ;;  %v7070_v45 = vsel %vm1512_vm3, %v1534_v11, %v1536_v14  ;;  %v1540_v11 = vrot.slane %v6817_v30, 1  ;;  %v1542_v14 = vrot.slane %v6822_v34, 1 }
  0x76   : > { %5447 = vmatprep.mubr.msk.bf16.mxu1 %vm764_vm2, %v7031_v35  ;;  %v736_v35 = vshll.u32 %v7049_v40, 16 }
  0x77   : > { %5742 = vmatmul.mubr.msk.bf16.gmra.mrb[12].mxu0 %vm764_vm2, %v7038_v47  ;;  %v7105_v5 = vsel %vm1512_vm3, %v1538_v31, %v1540_v11  ;;  %v1544_v31 = vrot.slane %v6848_v44, 1 }
  0x78   : > { %5745 = vmatprep.mubr.msk.bf16.mxu0 %vm764_vm2, %v7046_v8  ;;  %v738_v23 = vrot.slane %v736_v35, 1 }
  0x79   : > { %v7133_v43 = vsel %vm1512_vm3, %v1542_v14, %v1544_v31 }
  0x7a   : > { %v7095_v35 = vsel %vm503_vm1, %v734_v25, %v738_v23  ;;  %v742_v25 = vor.u32 %v740_v54, %v738_v23  ;;  %v756_v23 = vshrl.u32 %v7081_v9, 16 }
  0x7b   : > { %8143 = vst [vmem:[#allocation27_spill] sm:$0xff] %v7095_v35 }
  0x7d   : > { %5448 = vmatmul.mubr.msk.bf16.gmra.mrb[48].mxu1 %vm764_vm2, %v7058_v28  ;;  %v7100_v28 = vld [vmem:[%s6683_s30 + $0x100] sm:$0xf] }
  0x7e   : > { %5451 = vmatprep.mubr.msk.bf16.mxu1 %vm764_vm2, %v7063_v3  ;;  %v7090_v3 = vsel %vm503_vm1, %v726_v50, %v730_v36  ;;  %v746_v36 = vrot.slane %v744_v26, 1  ;;  %v7110_v50 = vsel %vm1512_vm3, %v1540_v11, %v1542_v14  ;;  %v7114_v57 = vcombine.low %v7100_v28, %v7100_v28 }
  0x7f   : > { %5746 = vmatmul.mubr.msk.bf16.gmra.mrb[16].mxu0 %vm764_vm2, %v7070_v45  ;;  %8142 = vst [vmem:[#allocation26_spill] sm:$0xff] %v7090_v3  ;;  %v1546_v11 = vrot.slane %v6853_v51, 1 }
  0x80   : > { %5749 = vmatprep.mubr.msk.bf16.mxu0 %vm764_vm2, %v7078_v58  ;;  %8144 = vst [vmem:[#allocation28_spill] sm:$0xff] %v7114_v57  ;;  %v750_v55 = vor.u32 %v748_v42, %v746_v36  ;;  %v7122_v26 = vsel %vm503_vm1, %v742_v25, %v746_v36  ;;  %v760_v54 = vshll.u32 %v7114_v57, 16  ;;  %v7140_v25 = vor.u32 %v756_v23, %v754_v46 }
  0x81   : > { %8145 = vst [vmem:[#allocation29_spill] sm:$0xff] %v7122_v26  ;;  %v7138_v36 = vsel %vm1512_vm3, %v1544_v31, %v1546_v11  ;;  %v1554_v23 = vrot.slane %v6915_v41, 1  ;;  %v1568_v57 = vrot.slane %v7041_v27, 1 }
  0x82   : > { %v7128_v42 = vsel %vm503_vm1, %v750_v55, %v754_v46  ;;  %8147 = vst [vmem:[#allocation31_spill] sm:$0xff] %v7140_v25  ;;  %v1548_v55 = vrot.slane %v6874_v0, 1 }
  0x83   : > { %8146 = vst [vmem:[#allocation30_spill] sm:$0xff] %v7128_v42 }
  0x84   : > { %v7152_v31 = vsel %vm1512_vm3, %v1546_v11, %v1548_v55  ;;  %v1675_v11 = vsel %vm861_vm0, %v6834_v39, 0  ;;  %v1556_v39 = vrot.slane %v6936_v62, 1 }
  0x85   : > { %5452 = vmatmul.mubr.msk.bf16.gmra.mrb[52].mxu1 %vm764_vm2, %v7090_v3  ;;  %v1566_v3 = vrot.slane %v7017_v18, 1 }
  0x86   : > { %5455 = vmatprep.mubr.msk.bf16.mxu1 %vm764_vm2, %v7095_v35  ;;  %v762_v35 = vrot.slane %v760_v54, 1  ;;  %v7170_v54 = vld [vmem:[%s8045_s1 + $0x6] sm:$0x3] }
  0x87   : > { %5750 = vmatmul.mubr.msk.bf16.gmra.mrb[20].mxu0 %vm764_vm2, %v7105_v5 }
  0x88   : > { %5753 = vmatprep.mubr.msk.bf16.mxu0 %vm764_vm2, %v7110_v50  ;;  %v763_v14 = vsel %vm503_vm1, %v7140_v25, %v762_v35  ;;  %v1552_v35 = vrot.slane %v6905_v32, 1  ;;  %v1560_v25 = vrot.slane %v6977_v56, 1 }
  0x8d   : > { %5456 = vmatmul.mubr.msk.bf16.gmra.mrb[56].mxu1 %vm764_vm2, %v7122_v26  ;;  %v1550_v26 = vrot.slane %v6889_v19, 1 }
  0x8e   : > { %5459 = vmatprep.mubr.msk.bf16.mxu1 %vm764_vm2, %v7128_v42  ;;  %v1562_v42 = vrot.slane %v6985_v24, 1 }
  0x8f   : > { %5754 = vmatmul.mubr.msk.bf16.gmra.mrb[24].mxu0 %vm764_vm2, %v7133_v43  ;;  %v7157_v46 = vsel %vm1512_vm3, %v1548_v55, %v1550_v26  ;;  %v7175_v55 = vsel %vm1512_vm3, %v1550_v26, %v1552_v35  ;;  %v1558_v26 = vrot.slane %v6946_v20, 1 }
  0x90   : > { %5757 = vmatprep.mubr.msk.bf16.mxu0 %vm764_vm2, %v7138_v36 }
  0x95   : > { %5460 = vmatmul.mubr.msk.bf16.gmra.mrb[60].mxu1 %vm764_vm2, %v763_v14  ;;  %v7180_v14 = vsel %vm1512_vm3, %v1552_v35, %v1554_v23  ;;  %v7198_v35 = vsel %vm1512_vm3, %v1556_v39, %v1558_v26 }
  0x96   : > { %5465 = vmatprep.mubr.msk.bf16.mxu1 %vm764_vm2, %v6686_v6  ;;  %8148 = vst [vmem:[#allocation32_spill] sm:$0xff] %v7198_v35 }
  0x97   : > { %5758 = vmatmul.mubr.msk.bf16.gmra.mrb[28].mxu0 %vm764_vm2, %v7152_v31 }
  0x98   : > { %5761 = vmatprep.mubr.msk.bf16.mxu0 %vm764_vm2, %v7157_v46 }
  0x9d   : > { %5466 = vmatmul.mubr.msk.bf16.vlgmr.msra.gmra.mrb[0].mxu1 %vm764_vm2, %v6689_v7 }
  0x9e   : > { %5530 = vmatpush3.bf16.msra.mxu1 %v1675_v11  ;;  %5469 = vmatprep.mubr.msk.bf16.mxu1 %vm764_vm2, %v6696_v12  ;;  %v7193_v11 = vsel %vm1512_vm3, %v1554_v23, %v1556_v39  ;;  %v7214_v23 = vsel %vm1512_vm3, %v1560_v25, %v1562_v42  ;;  %v1564_v39 = vrot.slane %v7009_v52, 1 }
  0x9f   : > { %6508 = vmatprep.subr.msk.bf16.mxu1 %vm861_vm0, %v7170_v54  ;;  %5762 = vmatmul.mubr.msk.bf16.gmra.mrb[32].mxu0 %vm764_vm2, %v7175_v55  ;;  %8150 = vst [vmem:[#allocation34_spill] sm:$0xff] %v7214_v23 }
  0xa0   : > { %5765 = vmatprep.mubr.msk.bf16.mxu0 %vm764_vm2, %v7180_v14 }
  0xa5   : > { %5470 = vmatmul.mubr.msk.bf16.gmra.mrb[4].mxu1 %vm764_vm2, %v6699_v13  ;;  %v7209_v13 = vsel %vm1512_vm3, %v1558_v26, %v1560_v25  ;;  %v7225_v26 = vsel %vm1512_vm3, %v1562_v42, %v1564_v39  ;;  %v7230_v25 = vsel %vm1512_vm3, %v1564_v39, %v1566_v3  ;;  %v7241_v42 = vsel %vm1512_vm3, %v1566_v3, %v1568_v57 }
  0xa6   : > { %5473 = vmatprep.mubr.msk.bf16.mxu1 %vm764_vm2, %v6702_v16  ;;  %8149 = vst [vmem:[#allocation33_spill] sm:$0xff] %v7209_v13  ;;  %8151 = vst [vmem:[#allocation35_spill] sm:$0xff] %v7225_v26 }
  0xa7   : > { %5766 = vmatmul.mubr.msk.bf16.gmra.mrb[36].mxu0 %vm764_vm2, %v7193_v11  ;;  %8152 = vst [vmem:[#allocation36_spill] sm:$0xff] %v7230_v25  ;;  %8153 = vst [vmem:[#allocation37_spill] sm:$0xff] %v7241_v42 }
  0xa8   : > { %5769 = vmatprep.mubr.msk.bf16.mxu0 %vm764_vm2, %v7198_v35 }
  0xad   : > { %5474 = vmatmul.mubr.msk.bf16.gmra.mrb[8].mxu1 %vm764_vm2, %v6705_v17 }
  0xae   : > { %5477 = vmatprep.mubr.msk.bf16.mxu1 %vm764_vm2, %v6715_v29 }
  0xaf   : > { %5770 = vmatmul.mubr.msk.bf16.gmra.mrb[40].mxu0 %vm764_vm2, %v7209_v13  ;;  %v7255_v13 = vrot.slane %v7081_v9, 1 }
  0xb0   : > { %5773 = vmatprep.mubr.msk.bf16.mxu0 %vm764_vm2, %v7214_v23  ;;  %v1570_v23 = vrot.slane %v7049_v40, 1 }
  0xb1   : > { %8155 = vst [vmem:[#allocation39_spill] sm:$0xff] %v7255_v13 }
  0xb2   : > { %v7246_v39 = vsel %vm1512_vm3, %v1568_v57, %v1570_v23 }
  0xb3   : > { %8154 = vst [vmem:[#allocation38_spill] sm:$0xff] %v7246_v39 }
  0xb5   : > { %5478 = vmatmul.mubr.msk.bf16.gmra.mrb[12].mxu1 %vm764_vm2, %v6722_v37 }
  0xb6   : > { %5481 = vmatprep.mubr.msk.bf16.mxu1 %vm764_vm2, %v6744_v49 }
  0xb7   : > { %5774 = vmatmul.mubr.msk.bf16.gmra.mrb[44].mxu0 %vm764_vm2, %v7225_v26  ;;  %v329_v26 = vld [vmem:[%s6683_s30 + $0x104] sm:$0xf] }
  0xb8   : > { %5777 = vmatprep.mubr.msk.bf16.mxu0 %vm764_vm2, %v7230_v25  ;;  %v1572_v25 = vrot.slane %v7073_v10, 1  ;;  %v7258_v3 = vcombine.low %v7100_v28, %v329_v26  ;;  %v7283_v26 = vld [vmem:[%s6683_s30 + $0x110] sm:$0xf] }
  0xba   : > { %v7263_v57 = vsel %vm1512_vm3, %v1570_v23, %v1572_v25  ;;  %v2793_v28 = vrot.slane %v7258_v3, 1 }
  0xbb   : > { %8156 = vst [vmem:[#allocation40_spill] sm:$0xff] %v7263_v57 }
  0xbd   : > { %5482 = vmatmul.mubr.msk.bf16.gmra.mrb[16].mxu1 %vm764_vm2, %v6749_v53 }
  0xbe   : > { %5485 = vmatprep.mubr.msk.bf16.mxu1 %vm764_vm2, %v6769_v61 }
  0xbf   : > { %5778 = vmatmul.mubr.msk.bf16.gmra.mrb[48].mxu0 %vm764_vm2, %v7241_v42  ;;  %v7272_v42 = vld [vmem:[%s6683_s30 + $0x108] sm:$0xff]  }
  0xc0   : > { %5781 = vmatprep.mubr.msk.bf16.mxu0 %vm764_vm2, %v7246_v39  ;;  %v7269_v39 = vsel %vm1512_vm3, %v1572_v25, %v7255_v13  ;;  %v7280_v23 = vrot.slane %v7272_v42, 1  ;;  %v7289_v25 = vsel %vm1512_vm3, %v7255_v13, %v2793_v28 }
  0xc1   : > { %8157 = vst [vmem:[#allocation41_spill] sm:$0xff] %v7269_v39  ;;  %8159 = vst [vmem:[#allocation43_spill] sm:$0xff] %v7289_v25 }
  0xc2   : > { %8158 = vst [vmem:[#allocation42_spill] sm:$0xff] %v7280_v23 }
  0xc5   : > { %5486 = vmatmul.mubr.msk.bf16.gmra.mrb[20].mxu1 %vm764_vm2, %v6774_v2 }
  0xc6   : > { %5489 = vmatprep.mubr.msk.bf16.mxu1 %vm764_vm2, %v6793_v15 }
  0xc7   : > { %5782 = vmatmul.mubr.msk.bf16.gmra.mrb[52].mxu0 %vm764_vm2, %v7263_v57  ;;  %v7293_v57 = vcombine.low %v7283_v26, %v7283_v26 }
  0xc8   : > { %5785 = vmatprep.mubr.msk.bf16.mxu0 %vm764_vm2, %v7269_v39  ;;  %v7299_v39 = vsel %vm1512_vm3, %v2793_v28, %v7280_v23  ;;  %v3570_v28 = vsel %vm861_vm0, %v6951_v22, 0 }
  0xc9   : > { %8160 = vst [vmem:[#allocation44_spill] sm:$0xff] %v7293_v57  ;;  %8161 = vst [vmem:[#allocation45_spill] sm:$0xff] %v7299_v39  ;;  %v2797_v13 = vrot.slane %v7293_v57, 1 }
  0xcb   : > { %v2798_v35 = vsel %vm1512_vm3, %v7280_v23, %v2797_v13  ;;  %v7324_v13 = vld [vmem:[%s8045_s1 + $0x10] sm:$0x3]  ;;  %v8188_v23 = vld [vmem:[#allocation17_spill] sm:$0xff] }
  0xcc   : > { %v3943_v22 = vsel %vm861_vm0, %v7324_v13, 0 }
  0xcd   : > { %5490 = vmatmul.mubr.msk.bf16.gmra.mrb[24].mxu1 %vm764_vm2, %v6798_v21 }
  0xce   : > { %5493 = vmatprep.mubr.msk.bf16.mxu1 %vm764_vm2, %v6817_v30 }
  0xcf   : > { %5786 = vmatmul.mubr.msk.bf16.gmra.mrb[56].mxu0 %vm764_vm2, %v7289_v25  ;;  %v8192_v25 = vld [vmem:[#allocation2_spill] sm:$0xff] }
  0xd0   : > { %5789 = vmatprep.mubr.msk.bf16.mxu0 %vm764_vm2, %v7299_v39  ;;  %v8190_v39 = vld [vmem:[#allocation18_spill] sm:$0xff] }
  0xd5   : > { %5494 = vmatmul.mubr.msk.bf16.gmra.mrb[28].mxu1 %vm764_vm2, %v6822_v34 }
  0xd6   : > { %5497 = vmatprep.mubr.msk.bf16.mxu1 %vm764_vm2, %v6848_v44 }
  0xd7   : > { %5790 = vmatmul.mubr.msk.bf16.gmra.mrb[60].mxu0 %vm764_vm2, %v2798_v35  ;;  %v8166_v35 = vld [vmem:[#allocation5_spill] sm:$0xff] }
  0xd8   : > { %5795 = vmatprep.mubr.msk.bf16.mxu0 %vm764_vm2, %v6702_v16  ;;  %v1513_v16 = vrot.slane %v6686_v6, 1  ;;  %v8162_v6 = vrot.slane %v6696_v12, 1 }
  0xdd   : > { %5498 = vmatmul.mubr.msk.bf16.gmra.mrb[32].mxu1 %vm764_vm2, %v6853_v51 }
  0xde   : > { %5501 = vmatprep.mubr.msk.bf16.mxu1 %vm764_vm2, %v6874_v0 }
  0xdf   : > { %5796 = vmatmul.mubr.msk.bf16.vlgmr.msra.gmra.mrb[0].mxu0 %vm764_vm2, %v6705_v17  ;;  %v1514_v17 = vrot.slane %v6689_v7, 1 }
  0xe0   : > { %5860 = vmatpush3.bf16.msra.mxu0 %v3570_v28  ;;  %5799 = vmatprep.mubr.msk.bf16.mxu0 %vm764_vm2, %v6715_v29  ;;  %v8168_v28 = vld [vmem:[#allocation7_spill] sm:$0xff] }
  0xe1   : > { %6514 = vmatprep.subr.msk.bf16.mxu0 %vm861_vm0, %v7324_v13  ;;  %v1515_v29 = vsel %vm1512_vm3, %v1513_v16, %v1514_v17  ;;  %v1517_v7 = vsel %vm1512_vm3, %v1514_v17, %v8162_v6  ;;  %v8169_v13 = vld [vmem:[#allocation32_spill] sm:$0xff]  ;;  %v8171_v17 = vld [vmem:[#allocation9_spill] sm:$0xff]  ;;  %v8173_v6 = vld [vmem:[#allocation34_spill] sm:$0xff] }
  0xe2   : > { %v8170_v16 = vld [vmem:[#allocation8_spill] sm:$0xff] }
  0xe5   : > { %5502 = vmatmul.mubr.msk.bf16.gmra.mrb[36].mxu1 %vm764_vm2, %v6889_v19 }
  0xe6   : > { %5505 = vmatprep.mubr.msk.bf16.mxu1 %vm764_vm2, %v6905_v32 }
  0xe7   : > { %5800 = vmatmul.mubr.msk.bf16.gmra.mrb[4].mxu0 %vm764_vm2, %v6722_v37  ;;  %v2047_v37 = vsel %vm861_vm0, %v7170_v54, 0  ;;  %v8165_v54 = vld [vmem:[#allocation4_spill] sm:$0xff] }
  0xe8   : > { %5803 = vmatprep.mubr.msk.bf16.mxu0 %vm764_vm2, %v6744_v49 }
  0xed   : > { %5506 = vmatmul.mubr.msk.bf16.gmra.mrb[40].mxu1 %vm764_vm2, %v6915_v41 }
  0xee   : > { %5509 = vmatprep.mubr.msk.bf16.mxu1 %vm764_vm2, %v6936_v62 }
  0xef   : > { %5804 = vmatmul.mubr.msk.bf16.gmra.mrb[8].mxu0 %vm764_vm2, %v6749_v53 }
  0xf0   : > { %5807 = vmatprep.mubr.msk.bf16.mxu0 %vm764_vm2, %v6769_v61 }
  0xf5   : > { %5510 = vmatmul.mubr.msk.bf16.gmra.mrb[44].mxu1 %vm764_vm2, %v6946_v20 }
  0xf6   : > { %5513 = vmatprep.mubr.msk.bf16.mxu1 %vm764_vm2, %v6977_v56 }
  0xf7   : > { %5808 = vmatmul.mubr.msk.bf16.gmra.mrb[12].mxu0 %vm764_vm2, %v6774_v2 }
  0xf8   : > { %5811 = vmatprep.mubr.msk.bf16.mxu0 %vm764_vm2, %v6793_v15 }
  0xfd   : > { %5514 = vmatmul.mubr.msk.bf16.gmra.mrb[48].mxu1 %vm764_vm2, %v6985_v24 }
  0xfe   : > { %5517 = vmatprep.mubr.msk.bf16.mxu1 %vm764_vm2, %v7009_v52 }
  0xff   : > { %5812 = vmatmul.mubr.msk.bf16.gmra.mrb[16].mxu0 %vm764_vm2, %v6798_v21 }
 0x100   : > { %5815 = vmatprep.mubr.msk.bf16.mxu0 %vm764_vm2, %v6817_v30 }
 0x105   : > { %5518 = vmatmul.mubr.msk.bf16.gmra.mrb[52].mxu1 %vm764_vm2, %v7017_v18 }
 0x106   : > { %5521 = vmatprep.mubr.msk.bf16.mxu1 %vm764_vm2, %v7041_v27 }
 0x107   : > { %5816 = vmatmul.mubr.msk.bf16.gmra.mrb[20].mxu0 %vm764_vm2, %v6822_v34 }
 0x108   : > { %5819 = vmatprep.mubr.msk.bf16.mxu0 %vm764_vm2, %v6848_v44 }
 0x10d   : > { %5522 = vmatmul.mubr.msk.bf16.gmra.mrb[56].mxu1 %vm764_vm2, %v7049_v40 }
 0x10e   : > { %5525 = vmatprep.mubr.msk.bf16.mxu1 %vm764_vm2, %v7073_v10 }
 0x10f   : > { %5820 = vmatmul.mubr.msk.bf16.gmra.mrb[24].mxu0 %vm764_vm2, %v6853_v51 }
 0x110   : > { %5823 = vmatprep.mubr.msk.bf16.mxu0 %vm764_vm2, %v6874_v0 }
 0x115   : > { %5526 = vmatmul.mubr.msk.bf16.gmra.mrb[60].mxu1 %vm764_vm2, %v7081_v9 }
 0x116   : > { %5531 = vmatprep.mubr.msk.bf16.mxu1 %vm764_vm2, %v1515_v29  ;;  %v8172_v29 = vld [vmem:[#allocation33_spill] sm:$0xff] }
 0x117   : > { %5824 = vmatmul.mubr.msk.bf16.gmra.mrb[28].mxu0 %vm764_vm2, %v6889_v19 }
 0x118   : > { %5827 = vmatprep.mubr.msk.bf16.mxu0 %vm764_vm2, %v6905_v32 }
 0x11d   : > { %5532 = vmatmul.mubr.msk.bf16.vlgmr.msra.gmra.mrb[0].mxu1 %vm764_vm2, %v1517_v7  ;;  %v8174_v7 = vld [vmem:[#allocation10_spill] sm:$0xff] }
 0x11e   : > { %5596 = vmatpush3.bf16.msra.mxu1 %v2047_v37  ;;  %5535 = vmatprep.mubr.msk.bf16.mxu1 %vm764_vm2, %v6912_v33  ;;  %v7457_v33 = vld [vmem:[%s6683_s30 + $0x118] sm:$0xff]   ;;  %v8175_v37 = vld [vmem:[#allocation11_spill] sm:$0xff] }
 0x11f   : > { %6510 = vmatprep.subr.msk.bf16.mxu1 %vm861_vm0, %v6658_v1  ;;  %5828 = vmatmul.mubr.msk.bf16.gmra.mrb[32].mxu0 %vm764_vm2, %v6915_v41  ;;  %v333_v1 = vld [vmem:[%s6683_s30 + $0x114] sm:$0xf] }
 0x120   : > { %5831 = vmatprep.mubr.msk.bf16.mxu0 %vm764_vm2, %v6936_v62  ;;  %v7448_v12 = vcombine.low %v7283_v26, %v333_v1  ;;  %v8167_v26 = vld [vmem:[#allocation6_spill] sm:$0xff]  ;;  %v8176_v1 = vld [vmem:[#allocation35_spill] sm:$0xff] }
 0x122   : > { %8163 = vst [vmem:[#allocation46_spill] sm:$0xff] %v7448_v12 }
 0x125   : > { %5536 = vmatmul.mubr.msk.bf16.gmra.mrb[4].mxu1 %vm764_vm2, %v6933_v59  ;;  %v8164_v59 = vld [vmem:[#allocation3_spill] sm:$0xff] }
 0x126   : > { %5539 = vmatprep.mubr.msk.bf16.mxu1 %vm764_vm2, %v6943_v4 }
 0x127   : > { %5832 = vmatmul.mubr.msk.bf16.gmra.mrb[36].mxu0 %vm764_vm2, %v6946_v20 }
 0x128   : > { %5835 = vmatprep.mubr.msk.bf16.mxu0 %vm764_vm2, %v6977_v56 }
 0x12d   : > { %5540 = vmatmul.mubr.msk.bf16.gmra.mrb[8].mxu1 %vm764_vm2, %v6974_v48 }
 0x12e   : > { %5543 = vmatprep.mubr.msk.bf16.mxu1 %vm764_vm2, %v6982_v60 }
 0x12f   : > { %5836 = vmatmul.mubr.msk.bf16.gmra.mrb[40].mxu0 %vm764_vm2, %v6985_v24 }
 0x130   : > { %5839 = vmatprep.mubr.msk.bf16.mxu0 %vm764_vm2, %v7009_v52 }
 0x135   : > { %5544 = vmatmul.mubr.msk.bf16.gmra.mrb[12].mxu1 %vm764_vm2, %v7006_v38 }
 0x136   : > { %5547 = vmatprep.mubr.msk.bf16.mxu1 %vm764_vm2, %v7014_v63 }
 0x137   : > { %5840 = vmatmul.mubr.msk.bf16.gmra.mrb[44].mxu0 %vm764_vm2, %v7017_v18 }
 0x138   : > { %5843 = vmatprep.mubr.msk.bf16.mxu0 %vm764_vm2, %v7041_v27 }
 0x13d   : > { %5548 = vmatmul.mubr.msk.bf16.gmra.mrb[16].mxu1 %vm764_vm2, %v7038_v47 }
 0x13e   : > { %5551 = vmatprep.mubr.msk.bf16.mxu1 %vm764_vm2, %v7046_v8 }
 0x13f   : > { %5844 = vmatmul.mubr.msk.bf16.gmra.mrb[48].mxu0 %vm764_vm2, %v7049_v40 }
 0x140   : > { %5847 = vmatprep.mubr.msk.bf16.mxu0 %vm764_vm2, %v7073_v10 }
 0x145   : > { %5552 = vmatmul.mubr.msk.bf16.gmra.mrb[20].mxu1 %vm764_vm2, %v7070_v45 }
 0x146   : > { %5555 = vmatprep.mubr.msk.bf16.mxu1 %vm764_vm2, %v7078_v58 }
 0x147   : > { %5848 = vmatmul.mubr.msk.bf16.gmra.mrb[52].mxu0 %vm764_vm2, %v7081_v9 }
 0x148   : > { %5851 = vmatprep.mubr.msk.bf16.mxu0 %vm764_vm2, %v7258_v3 }
 0x14d   : > { %5556 = vmatmul.mubr.msk.bf16.gmra.mrb[24].mxu1 %vm764_vm2, %v7105_v5 }
 0x14e   : > { %5559 = vmatprep.mubr.msk.bf16.mxu1 %vm764_vm2, %v7110_v50 }
 0x14f   : > { %5852 = vmatmul.mubr.msk.bf16.gmra.mrb[56].mxu0 %vm764_vm2, %v7272_v42 }
 0x150   : > { %5855 = vmatprep.mubr.msk.bf16.mxu0 %vm764_vm2, %v7448_v12 }
 0x155   : > { %5560 = vmatmul.mubr.msk.bf16.gmra.mrb[28].mxu1 %vm764_vm2, %v7133_v43 }
 0x156   : > { %5563 = vmatprep.mubr.msk.bf16.mxu1 %vm764_vm2, %v7138_v36 }
 0x157   : > { %5856 = vmatmul.mubr.msk.bf16.gmra.mrb[60].mxu0 %vm764_vm2, %v7457_v33 }
 0x158   : > { %5861 = vmatprep.mubr.msk.bf16.mxu0 %vm764_vm2, %v8164_v59  ;;  %v8177_v59 = vld [vmem:[#allocation36_spill] sm:$0xff] }
 0x15d   : > { %5564 = vmatmul.mubr.msk.bf16.gmra.mrb[32].mxu1 %vm764_vm2, %v7152_v31 }
 0x15e   : > { %5567 = vmatprep.mubr.msk.bf16.mxu1 %vm764_vm2, %v7157_v46 }
 0x15f   : > { %5862 = vmatmul.mubr.msk.bf16.vlgmr.msra.gmra.mrb[0].mxu0 %vm764_vm2, %v8165_v54  ;;  %v8179_v54 = vld [vmem:[#allocation13_spill] sm:$0xff] }
 0x160   : > { %5926 = vmatpush3.bf16.msra.mxu0 %v3943_v22  ;;  %5865 = vmatprep.mubr.msk.bf16.mxu0 %vm764_vm2, %v8166_v35  ;;  %v8178_v22 = vld [vmem:[#allocation12_spill] sm:$0xff]  ;;  %v8180_v35 = vld [vmem:[#allocation37_spill] sm:$0xff] }
 0x165   : > { %5568 = vmatmul.mubr.msk.bf16.gmra.mrb[36].mxu1 %vm764_vm2, %v7175_v55 }
 0x166   : > { %5571 = vmatprep.mubr.msk.bf16.mxu1 %vm764_vm2, %v7180_v14 }
 0x167   : > { %5866 = vmatmul.mubr.msk.bf16.gmra.mrb[4].mxu0 %vm764_vm2, %v8167_v26  ;;  %v8181_v26 = vld [vmem:[#allocation38_spill] sm:$0xff] }
 0x168   : > { %5869 = vmatprep.mubr.msk.bf16.mxu0 %vm764_vm2, %v8168_v28  ;;  %v8182_v28 = vld [vmem:[#allocation14_spill] sm:$0xff] }
 0x16d   : > { %5572 = vmatmul.mubr.msk.bf16.gmra.mrb[40].mxu1 %vm764_vm2, %v7193_v11 }
 0x16e   : > { %5575 = vmatprep.mubr.msk.bf16.mxu1 %vm764_vm2, %v8169_v13 }
 0x16f   : > { %5870 = vmatmul.mubr.msk.bf16.gmra.mrb[8].mxu0 %vm764_vm2, %v8170_v16  ;;  %v8183_v16 = vld [vmem:[#allocation15_spill] sm:$0xff] }
 0x170   : > { %5873 = vmatprep.mubr.msk.bf16.mxu0 %vm764_vm2, %v8171_v17  ;;  %v8184_v17 = vld [vmem:[#allocation40_spill] sm:$0xff] }
 0x175   : > { %5576 = vmatmul.mubr.msk.bf16.gmra.mrb[44].mxu1 %vm764_vm2, %v8172_v29 }
 0x176   : > { %5579 = vmatprep.mubr.msk.bf16.mxu1 %vm764_vm2, %v8173_v6 }
 0x177   : > { %5874 = vmatmul.mubr.msk.bf16.gmra.mrb[12].mxu0 %vm764_vm2, %v8174_v7  ;;  %v8185_v7 = vld [vmem:[#allocation41_spill] sm:$0xff] }
 0x178   : > { %5877 = vmatprep.mubr.msk.bf16.mxu0 %vm764_vm2, %v8175_v37  ;;  %v8186_v37 = vld [vmem:[#allocation28_spill] sm:$0xff] }
 0x17d   : > { %5580 = vmatmul.mubr.msk.bf16.gmra.mrb[48].mxu1 %vm764_vm2, %v8176_v1 }
 0x17e   : > { %5583 = vmatprep.mubr.msk.bf16.mxu1 %vm764_vm2, %v8177_v59  ;;  %v2418_v59 = vshrl.u32 %v7272_v42, 16 }
 0x17f   : > { %5878 = vmatmul.mubr.msk.bf16.gmra.mrb[16].mxu0 %vm764_vm2, %v8178_v22  ;;  %v1576_v22 = vrot.slane %v8186_v37, 1  ;;  %v8191_v37 = vld [vmem:[#allocation19_spill] sm:$0xff] }
 0x180   : > { %5881 = vmatprep.mubr.msk.bf16.mxu0 %vm764_vm2, %v8179_v54  ;;  %v8187_v54 = vld [vmem:[#allocation16_spill] sm:$0xff] }
 0x185   : > { %5584 = vmatmul.mubr.msk.bf16.gmra.mrb[52].mxu1 %vm764_vm2, %v8180_v35  ;;  %v8201_v35 = vld [vmem:[#allocation29_spill] sm:$0xff] }
 0x186   : > { %5587 = vmatprep.mubr.msk.bf16.mxu1 %vm764_vm2, %v8181_v26  ;;  %v8198_v26 = vld [vmem:[#allocation25_spill] sm:$0xff] }
 0x187   : > { %5882 = vmatmul.mubr.msk.bf16.gmra.mrb[20].mxu0 %vm764_vm2, %v8182_v28  ;;  %v8189_v28 = vld [vmem:[#allocation39_spill] sm:$0xff] }
 0x188   : > { %5885 = vmatprep.mubr.msk.bf16.mxu0 %vm764_vm2, %v8183_v16  ;;  %v1577_v57 = vsel %vm1512_vm3, %v8189_v28, %v1576_v22  ;;  %v6579_v16 = vld [vmem:[%s6683_s30 + $0x10] sm:$0xff]   ;;  %v6582_v28 = vld [vmem:[%s6683_s30 + $0x28] sm:$0xff]  }
 0x189   : > { %v8193_v22 = vld [vmem:[#allocation20_spill] sm:$0xff] }
 0x18d   : > { %5588 = vmatmul.mubr.msk.bf16.gmra.mrb[56].mxu1 %vm764_vm2, %v8184_v17  ;;  %v8195_v17 = vld [vmem:[#allocation22_spill] sm:$0xff] }
 0x18e   : > { %5591 = vmatprep.mubr.msk.bf16.mxu1 %vm764_vm2, %v8185_v7  ;;  %v6581_v7 = vld [vmem:[%s6683_s30 + $0x20] sm:$0xff]  }
 0x18f   : > { %5886 = vmatmul.mubr.msk.bf16.gmra.mrb[24].mxu0 %vm764_vm2, %v8187_v54  ;;  %v6580_v54 = vld [vmem:[%s6683_s30 + $0x18] sm:$0xff]  }
 0x190   : > { %5889 = vmatprep.mubr.msk.bf16.mxu0 %vm764_vm2, %v8188_v23 }
 0x195   : > { %5592 = vmatmul.mubr.msk.bf16.gmra.mrb[60].mxu1 %vm764_vm2, %v1577_v57  ;;  %v8194_v57 = vld [vmem:[#allocation21_spill] sm:$0xff] }
 0x196   : > { %5597 = vmatprep.mubr.msk.bf16.mxu1 %vm764_vm2, %v6579_v16  ;;  %v6583_v16 = vld [vmem:[%s6683_s30 + $0x30] sm:$0xff]  }
 0x197   : > { %5890 = vmatmul.mubr.msk.bf16.gmra.mrb[28].mxu0 %vm764_vm2, %v8190_v39 }
 0x198   : > { %5893 = vmatprep.mubr.msk.bf16.mxu0 %vm764_vm2, %v8191_v37 }
 0x19d   : > { %5598 = vmatmul.mubr.msk.bf16.vlgmr.msra.gmra.mrb[0].mxu1 %vm764_vm2, %v6580_v54  ;;  %v8196_v54 = vld [vmem:[#allocation23_spill] sm:$0xff] }
 0x19e   : > { %5992 = vmatpush3.bf16.msra.mxu1 %v8192_v25  ;;  %5601 = vmatprep.mubr.msk.bf16.mxu1 %vm764_vm2, %v6581_v7  ;;  %v6584_v25 = vld [vmem:[%s6683_s30 + $0x38] sm:$0xff]   ;;  %v8197_v7 = vld [vmem:[#allocation24_spill] sm:$0xff] }
 0x19f   : > { %5894 = vmatmul.mubr.msk.bf16.gmra.mrb[32].mxu0 %vm764_vm2, %v8193_v22 }
 0x1a0   : > { %5897 = vmatprep.mubr.msk.bf16.mxu0 %vm764_vm2, %v8194_v57 }
 0x1a5   : > { %5602 = vmatmul.mubr.msk.bf16.gmra.mrb[4].mxu1 %vm764_vm2, %v6582_v28  ;;  %v8199_v28 = vld [vmem:[#allocation26_spill] sm:$0xff] }
 0x1a6   : > { %5605 = vmatprep.mubr.msk.bf16.mxu1 %vm764_vm2, %v6583_v16  ;;  %v8200_v16 = vld [vmem:[#allocation27_spill] sm:$0xff] }
 0x1a7   : > { %5898 = vmatmul.mubr.msk.bf16.gmra.mrb[36].mxu0 %vm764_vm2, %v8195_v17 }
 0x1a8   : > { %5901 = vmatprep.mubr.msk.bf16.mxu0 %vm764_vm2, %v8196_v54 }
 0x1ad   : > { %5606 = vmatmul.mubr.msk.bf16.gmra.mrb[8].mxu1 %vm764_vm2, %v6584_v25  ;;  %v2411_v25 = vshrl.u32 %v7258_v3, 16 }
 0x1ae   : > { %5609 = vmatprep.mubr.msk.bf16.mxu1 %vm764_vm2, %v6744_v49  ;;  %v2407_v49 = vshll.u32 %v7258_v3, 16 }
 0x1af   : > { %5902 = vmatmul.mubr.msk.bf16.gmra.mrb[40].mxu0 %vm764_vm2, %v8197_v7  ;;  %v3541_v7 = vshll.u32 %v7448_v12, 16 }
 0x1b0   : > { %5905 = vmatprep.mubr.msk.bf16.mxu0 %vm764_vm2, %v8198_v26 }
 0x1b5   : > { %5610 = vmatmul.mubr.msk.bf16.gmra.mrb[12].mxu1 %vm764_vm2, %v6749_v53  ;;  %v2414_v53 = vshll.u32 %v7272_v42, 16 }
 0x1b6   : > { %5613 = vmatprep.mubr.msk.bf16.mxu1 %vm764_vm2, %v6769_v61  ;;  %v2409_v61 = vrot.slane %v2407_v49, 1 }
 0x1b7   : > { %5906 = vmatmul.mubr.msk.bf16.gmra.mrb[44].mxu0 %vm764_vm2, %v8199_v28  ;;  %v8202_v28 = vld [vmem:[#allocation30_spill] sm:$0xff]  ;;  %v2416_v26 = vrot.slane %v2414_v53, 1  ;;  %v3548_v53 = vshll.u32 %v7457_v33, 16 }
 0x1b8   : > { %5909 = vmatprep.mubr.msk.bf16.mxu0 %vm764_vm2, %v8200_v16  ;;  %v2413_v16 = vor.u32 %v2411_v25, %v2409_v61  ;;  %v3545_v25 = vshrl.u32 %v7448_v12, 16  ;;  %v3552_v12 = vshrl.u32 %v7457_v33, 16 }
 0x1ba   : > { %v7590_v49 = vsel %vm503_vm1, %v2413_v16, %v2416_v26 }
 0x1bd   : > { %5614 = vmatmul.mubr.msk.bf16.gmra.mrb[16].mxu1 %vm764_vm2, %v6774_v2  ;;  %v8203_v2 = vld [vmem:[#allocation31_spill] sm:$0xff] }
 0x1be   : > { %5617 = vmatprep.mubr.msk.bf16.mxu1 %vm764_vm2, %v6793_v15  ;;  %v7584_v15 = vsel %vm503_vm1, %v8203_v2, %v2409_v61  ;;  %v7598_v61 = vor.u32 %v2418_v59, %v2416_v26  ;;  %v7601_v2 = vld [vmem:[%s6683_s30 + $0x120] ss:$0 sps:$4 sm:$0xff]  }
 0x1bf   : > { %5910 = vmatmul.mubr.msk.bf16.gmra.mrb[48].mxu0 %vm764_vm2, %v8201_v35  ;;  %8204 = vst [vmem:[#allocation3_spill] sm:$0xff] %v7584_v15 }
 0x1c0   : > { %5913 = vmatprep.mubr.msk.bf16.mxu0 %vm764_vm2, %v8202_v28 }
 0x1c5   : > { %5618 = vmatmul.mubr.msk.bf16.gmra.mrb[20].mxu1 %vm764_vm2, %v6798_v21  ;;  %v3543_v21 = vrot.slane %v3541_v7, 1 }
 0x1c6   : > { %5621 = vmatprep.mubr.msk.bf16.mxu1 %vm764_vm2, %v6817_v30  ;;  %v3550_v30 = vrot.slane %v3548_v53, 1 }
 0x1c7   : > { %5914 = vmatmul.mubr.msk.bf16.gmra.mrb[52].mxu0 %vm764_vm2, %v7584_v15  ;;  %v3547_v28 = vor.u32 %v3545_v25, %v3543_v21  ;;  %v3544_v16 = vsel %vm503_vm1, %v7598_v61, %v3543_v21  ;;  %v3556_v15 = vshll.u32 %v7601_v2, 16 }
 0x1c8   : > { %5917 = vmatprep.mubr.msk.bf16.mxu0 %vm764_vm2, %v7590_v49  ;;  %v3554_v26 = vor.u32 %v3552_v12, %v3550_v30 }
 0x1c9   : > { %v3551_v59 = vsel %vm503_vm1, %v3547_v28, %v3550_v30  ;;  %v3558_v7 = vrot.slane %v3556_v15, 1  ;;  %v7805_v30 = vld [vmem:[%s8046_s2] ss:$0 sm:$0xff] }
 0x1cd   : > { %5622 = vmatmul.mubr.msk.bf16.gmra.mrb[24].mxu1 %vm764_vm2, %v6822_v34  ;;  %v3559_v34 = vsel %vm503_vm1, %v3554_v26, %v3558_v7  ;;  %v7810_v26 = vld [vmem:[%s8047_s3] ss:$0 sm:$0xff] }
 0x1ce   : > { %5625 = vmatprep.mubr.msk.bf16.mxu1 %vm764_vm2, %v6848_v44  ;;  %v8208_v44 = vld [vmem:[#allocation37_spill] sm:$0xff] }
 0x1cf   : > { %5918 = vmatmul.mubr.msk.bf16.gmra.mrb[56].mxu0 %vm764_vm2, %v3544_v16 }
 0x1d0   : > { %5921 = vmatprep.mubr.msk.bf16.mxu0 %vm764_vm2, %v3551_v59 }
 0x1d5   : > { %5626 = vmatmul.mubr.msk.bf16.gmra.mrb[28].mxu1 %vm764_vm2, %v6853_v51  ;;  %v8209_v51 = vld [vmem:[#allocation38_spill] sm:$0xff] }
 0x1d6   : > { %5629 = vmatprep.mubr.msk.bf16.mxu1 %vm764_vm2, %v6874_v0  ;;  %v8210_v0 = vld [vmem:[#allocation26_spill] sm:$0xff] }
 0x1d7   : > { %5922 = vmatmul.mubr.msk.bf16.gmra.mrb[60].mxu0 %vm764_vm2, %v3559_v34 }
 0x1d8   : > { %5927 = vmatprep.mubr.msk.bf16.mxu0 %vm764_vm2, %v6943_v4  ;;  %v8217_v4 = vld [vmem:[#allocation46_spill] sm:$0xff] }
 0x1dd   : > { %5630 = vmatmul.mubr.msk.bf16.gmra.mrb[32].mxu1 %vm764_vm2, %v6889_v19  ;;  %v8212_v19 = vld [vmem:[#allocation40_spill] sm:$0xff] }
 0x1de   : > { %5633 = vmatprep.mubr.msk.bf16.mxu1 %vm764_vm2, %v6905_v32  ;;  %v8214_v32 = vld [vmem:[#allocation30_spill] sm:$0xff] }
 0x1df   : > { %5928 = vmatmul.mubr.msk.bf16.vlgmr.msra.gmra.mrb[0].mxu0 %vm764_vm2, %v6974_v48  ;;  %v8218_v48 = vld [vmem:[#allocation44_spill] sm:$0xff] }
 0x1e0   : > { %5931 = vmatprep.mubr.msk.bf16.mxu0 %vm764_vm2, %v6982_v60  ;;  %v8219_v60 = vld [vmem:[#allocation3_spill] sm:$0xff] }
 0x1e5   : > { %5634 = vmatmul.mubr.msk.bf16.gmra.mrb[36].mxu1 %vm764_vm2, %v6915_v41  ;;  %v8215_v41 = vld [vmem:[#allocation43_spill] sm:$0xff] }
 0x1e6   : > { %5637 = vmatprep.mubr.msk.bf16.mxu1 %vm764_vm2, %v6936_v62  ;;  %v8216_v62 = vld [vmem:[#allocation45_spill] sm:$0xff] }
 0x1e7   : > { %5932 = vmatmul.mubr.msk.bf16.gmra.mrb[4].mxu0 %vm764_vm2, %v7006_v38  ;;  %v3929_v38 = vrot.slane %v7457_v33, 1 }
 0x1e8   : > { %5935 = vmatprep.mubr.msk.bf16.mxu0 %vm764_vm2, %v7014_v63 }
 0x1ed   : > { %5638 = vmatmul.mubr.msk.bf16.gmra.mrb[40].mxu1 %vm764_vm2, %v6946_v20  ;;  %v3927_v20 = vrot.slane %v8217_v4, 1 }
 0x1ee   : > { %5641 = vmatprep.mubr.msk.bf16.mxu1 %vm764_vm2, %v6977_v56  ;;  %v2422_v56 = vshll.u32 %v8218_v48, 16 }
 0x1ef   : > { %5936 = vmatmul.mubr.msk.bf16.gmra.mrb[8].mxu0 %vm764_vm2, %v7038_v47  ;;  %v8220_v47 = vld [vmem:[#allocation42_spill] sm:$0xff]  ;;  %v3930_v63 = vsel %vm1512_vm3, %v3927_v20, %v3929_v38 }
 0x1f0   : > { %5939 = vmatprep.mubr.msk.bf16.mxu0 %vm764_vm2, %v7046_v8 }
 0x1f5   : > { %5642 = vmatmul.mubr.msk.bf16.gmra.mrb[44].mxu1 %vm764_vm2, %v6985_v24  ;;  %v8213_v24 = vld [vmem:[#allocation41_spill] sm:$0xff] }
 0x1f6   : > { %5645 = vmatprep.mubr.msk.bf16.mxu1 %vm764_vm2, %v7009_v52  ;;  %v3928_v52 = vsel %vm1512_vm3, %v8220_v47, %v3927_v20 }
 0x1f7   : > { %5940 = vmatmul.mubr.msk.bf16.gmra.mrb[12].mxu0 %vm764_vm2, %v7070_v45  ;;  %v2424_v45 = vrot.slane %v2422_v56, 1 }
 0x1f8   : > { %5943 = vmatprep.mubr.msk.bf16.mxu0 %vm764_vm2, %v7078_v58 }
 0x1f9   : > { %v2425_v8 = vsel %vm503_vm1, %v7598_v61, %v2424_v45 }
 0x1fd   : > { %5646 = vmatmul.mubr.msk.bf16.gmra.mrb[48].mxu1 %vm764_vm2, %v7017_v18  ;;  %v8211_v18 = vld [vmem:[#allocation27_spill] sm:$0xff] }
 0x1fe   : > { %5649 = vmatprep.mubr.msk.bf16.mxu1 %vm764_vm2, %v7041_v27  ;;  %v3931_v27 = vrot.slane %v7601_v2, 1 }
 0x1ff   : > { %5944 = vmatmul.mubr.msk.bf16.gmra.mrb[16].mxu0 %vm764_vm2, %v7105_v5  ;;  %v8205_v5 = vld [vmem:[#allocation36_spill] sm:$0xff] }
 0x200   : > { %5947 = vmatprep.mubr.msk.bf16.mxu0 %vm764_vm2, %v7110_v50 }
 0x205   : > { %5650 = vmatmul.mubr.msk.bf16.gmra.mrb[52].mxu1 %vm764_vm2, %v7049_v40  ;;  %v8207_v40 = vld [vmem:[#allocation25_spill] sm:$0xff] }
 0x206   : > { %5653 = vmatprep.mubr.msk.bf16.mxu1 %vm764_vm2, %v7073_v10  ;;  %v3932_v10 = vsel %vm1512_vm3, %v3929_v38, %v3931_v27 }
 0x207   : > { %5948 = vmatmul.mubr.msk.bf16.gmra.mrb[20].mxu0 %vm764_vm2, %v7133_v43 }
 0x208   : > { %5951 = vmatprep.mubr.msk.bf16.mxu0 %vm764_vm2, %v7138_v36 }
 0x20d   : > { %5654 = vmatmul.mubr.msk.bf16.gmra.mrb[56].mxu1 %vm764_vm2, %v7081_v9  ;;  %v8206_v9 = vld [vmem:[#allocation24_spill] sm:$0xff] }
 0x20e   : > { %5657 = vmatprep.mubr.msk.bf16.mxu1 %vm764_vm2, %v7258_v3 }
 0x20f   : > { %5952 = vmatmul.mubr.msk.bf16.gmra.mrb[24].mxu0 %vm764_vm2, %v7152_v31 }
 0x210   : > { %5955 = vmatprep.mubr.msk.bf16.mxu0 %vm764_vm2, %v7157_v46 }
 0x215   : > { %5658 = vmatmul.mubr.msk.bf16.gmra.mrb[60].mxu1 %vm764_vm2, %v7272_v42 }
 0x216   : > { %5695 = vmatprep.mubr.msk.bf16.mxu1 %vm764_vm2, %v8188_v23 }
 0x217   : > { %5956 = vmatmul.mubr.msk.bf16.gmra.mrb[28].mxu0 %vm764_vm2, %v7175_v55 }
 0x218   : > { %5959 = vmatprep.mubr.msk.bf16.mxu0 %vm764_vm2, %v7180_v14 }
 0x21d   : > { %5696 = vmatmul.mubr.msk.bf16.vlgmr.msra.gmra.mrb[32].mxu1 %vm764_vm2, %v8190_v39 }
 0x21e   : > { %5699 = vmatprep.mubr.msk.bf16.mxu1 %vm764_vm2, %v8191_v37 }
 0x21f   : > { %5960 = vmatmul.mubr.msk.bf16.gmra.mrb[32].mxu0 %vm764_vm2, %v7193_v11 }
 0x220   : > { %5963 = vmatprep.mubr.msk.bf16.mxu0 %vm764_vm2, %v8169_v13 }
 0x225   : > { %5700 = vmatmul.mubr.msk.bf16.gmra.mrb[36].mxu1 %vm764_vm2, %v8193_v22 }
 0x226   : > { %5703 = vmatprep.mubr.msk.bf16.mxu1 %vm764_vm2, %v8194_v57 }
 0x227   : > { %5964 = vmatmul.mubr.msk.bf16.gmra.mrb[36].mxu0 %vm764_vm2, %v8172_v29 }
 0x228   : > { %5967 = vmatprep.mubr.msk.bf16.mxu0 %vm764_vm2, %v8173_v6 }
 0x22d   : > { %5704 = vmatmul.mubr.msk.bf16.gmra.mrb[40].mxu1 %vm764_vm2, %v8195_v17 }
 0x22e   : > { %5707 = vmatprep.mubr.msk.bf16.mxu1 %vm764_vm2, %v8196_v54 }
 0x22f   : > { %5968 = vmatmul.mubr.msk.bf16.gmra.mrb[40].mxu0 %vm764_vm2, %v8176_v1 }
 0x230   : > { %5971 = vmatprep.mubr.msk.bf16.mxu0 %vm764_vm2, %v8205_v5 }
 0x235   : > { %5708 = vmatmul.mubr.msk.bf16.gmra.mrb[44].mxu1 %vm764_vm2, %v8206_v9 }
 0x236   : > { %5711 = vmatprep.mubr.msk.bf16.mxu1 %vm764_vm2, %v8207_v40 }
 0x237   : > { %5972 = vmatmul.mubr.msk.bf16.gmra.mrb[44].mxu0 %vm764_vm2, %v8208_v44 }
 0x238   : > { %5975 = vmatprep.mubr.msk.bf16.mxu0 %vm764_vm2, %v8209_v51 }
 0x23d   : > { %5712 = vmatmul.mubr.msk.bf16.gmra.mrb[48].mxu1 %vm764_vm2, %v8210_v0 }
 0x23e   : > { %5715 = vmatprep.mubr.msk.bf16.mxu1 %vm764_vm2, %v8211_v18 }
 0x23f   : > { %5976 = vmatmul.mubr.msk.bf16.gmra.mrb[48].mxu0 %vm764_vm2, %v8212_v19 }
 0x240   : > { %5979 = vmatprep.mubr.msk.bf16.mxu0 %vm764_vm2, %v8213_v24 }
 0x245   : > { %5716 = vmatmul.mubr.msk.bf16.gmra.mrb[52].mxu1 %vm764_vm2, %v8201_v35 }
 0x246   : > { %5719 = vmatprep.mubr.msk.bf16.mxu1 %vm764_vm2, %v8214_v32 }
 0x247   : > { %5980 = vmatmul.mubr.msk.bf16.gmra.mrb[52].mxu0 %vm764_vm2, %v8215_v41 }
 0x248   : > { %5983 = vmatprep.mubr.msk.bf16.mxu0 %vm764_vm2, %v8216_v62 }
 0x24d   : > { %5720 = vmatmul.mubr.msk.bf16.gmra.mrb[56].mxu1 %vm764_vm2, %v8219_v60 }
 0x24e   : > { %5723 = vmatprep.mubr.msk.bf16.mxu1 %vm764_vm2, %v7590_v49 }
 0x24f   : > { %5984 = vmatmul.mubr.msk.bf16.gmra.mrb[56].mxu0 %vm764_vm2, %v3928_v52 }
 0x250   : > { %5987 = vmatprep.mubr.msk.bf16.mxu0 %vm764_vm2, %v3930_v63 }
 0x255   : > { %5724 = vmatmul.mubr.msk.bf16.gmra.mrb[60].mxu1 %vm764_vm2, %v2425_v8 }
 0x257   : > { %5988 = vmatmul.mubr.msk.bf16.gmra.mrb[60].mxu0 %vm764_vm2, %v3932_v10 }
 0x270   : > { %v5599_v58 = vpop.f32.mrb[0].mxu1 }
 0x271   : > { %v2083_v50 = vpop.f32.mrb[1].mxu1 }
 0x272   : > { %v5600_v43 = vpop.f32.mrb[2].mxu1 }
 0x273   : > { %v2086_v36 = vpop.f32.mrb[3].mxu1 }
 0x278   : > { %v5603_v31 = vpop.f32.mrb[4].mxu1 }
 0x279   : > { %v2099_v46 = vpop.f32.mrb[5].mxu1 }
 0x27a   : > { %v5604_v55 = vpop.f32.mrb[6].mxu1 }
 0x27b   : > { %v7752_v14 = vpop.f32.mrb[7].mxu1 }
 0x280   : > { %v7754_v11 = vpop.f32.mrb[8].mxu1 }
 0x281   : > { %v7756_v42 = vpop.f32.mrb[9].mxu1 }
 0x282   : > { %v7758_v39 = vpop.f32.mrb[10].mxu1 }
 0x283   : > { %v7760_v3 = vpop.f32.mrb[11].mxu1 }
 0x288   : > { %v7762_v23 = vpop.f32.mrb[12].mxu1 }
 0x289   : > { %v7764_v12 = vpop.f32.mrb[13].mxu1 }
 0x28a   : > { %v7766_v33 = vpop.f32.mrb[14].mxu1 }
 0x28b   : > { %v7768_v13 = vpop.f32.mrb[15].mxu1 }
 0x290   : > { %v7770_v29 = vpop.f32.mrb[16].mxu1 }
 0x291   : > { %v7772_v6 = vpop.f32.mrb[17].mxu1 }
 0x292   : > { %v7774_v1 = vpop.f32.mrb[18].mxu1 }
 0x293   : > { %v7776_v35 = vpop.f32.mrb[19].mxu1 }
 0x298   : > { %v7778_v17 = vpop.f32.mrb[20].mxu1 }
 0x299   : > { %v7780_v37 = vpop.f32.mrb[21].mxu1 }
 0x29a   : > { %v7782_v22 = vpop.f32.mrb[22].mxu1 }
 0x29b   : > { %v7784_v57 = vpop.f32.mrb[23].mxu1 }
 0x2a0   : > { %v7786_v54 = vpop.f32.mrb[24].mxu1 }
 0x2a1   : > { %v7788_v28 = vpop.f32.mrb[25].mxu1 }
 0x2a2   : > { %v7790_v15 = vpop.f32.mrb[26].mxu1 }
 0x2a3   : > { %v7792_v49 = vpop.f32.mrb[27].mxu1 }
 0x2a8   : > { %v7794_v25 = vpop.f32.mrb[28].mxu1 }
 0x2a9   : > { %v7796_v53 = vpop.f32.mrb[29].mxu1 }
 0x2aa   : > { %v7798_v21 = vpop.f32.mrb[30].mxu1 }
 0x2ab   : > { %v7800_v61 = vpop.f32.mrb[31].mxu1 }
 0x2b2   : > { %v5929_v2 = vpop.f32.mrb[0].mxu0 }
 0x2b3   : > { %v5993_v16 = vadd.f32 %v5929_v2, %v5599_v58  ;;  %v3979_v59 = vpop.f32.mrb[1].mxu0 }
 0x2b4   : > { %v5994_v7 = vadd.f32 %v3979_v59, %v2083_v50  ;;  %v5930_v34 = vpop.f32.mrb[2].mxu0 }
 0x2b5   : > { %v4307_v5 = vmul.f32 %v5993_v16, %v7805_v30  ;;  %v5995_v9 = vadd.f32 %v5930_v34, %v5600_v43  ;;  %v3982_v40 = vpop.f32.mrb[3].mxu0 }
 0x2b6   : > { %v4305_v44 = vmul.f32 %v5994_v7, %v7805_v30  ;;  %v5996_v51 = vadd.f32 %v3982_v40, %v2086_v36 }
 0x2b7   : > { %v4378_v0 = vadd.f32 %v7810_v26, %v4307_v5  ;;  %v4308_v18 = vmul.f32 %v5995_v9, %v7805_v30 }
 0x2b8   : > { %v4376_v19 = vadd.f32 %v7810_v26, %v4305_v44  ;;  %v4306_v24 = vmul.f32 %v5996_v51, %v7805_v30 }
 0x2b9   : > { %v4442_v32 = vmul.f32 0.01, %v4378_v0  ;;  %v4379_v41 = vadd.f32 %v7810_v26, %v4308_v18 }
 0x2ba   : > { %v4440_v62 = vmul.f32 0.01, %v4376_v19  ;;  %v4377_v4 = vadd.f32 %v7810_v26, %v4306_v24  ;;  %v5933_v20 = vpop.f32.mrb[4].mxu0 }
 0x2bb   : > { %v4506_v38 = vmax.f32 %v4378_v0, %v4442_v32  ;;  %v4443_v48 = vmul.f32 0.01, %v4379_v41  ;;  %v5997_v56 = vadd.f32 %v5933_v20, %v5603_v31  ;;  %v3995_v60 = vpop.f32.mrb[5].mxu0 }
 0x2bc   : > { %v4504_v47 = vmax.f32 %v4376_v19, %v4440_v62  ;;  %v4441_v52 = vmul.f32 0.01, %v4377_v4  ;;  %v5998_v63 = vadd.f32 %v3995_v60, %v2099_v46  ;;  %v5934_v45 = vpop.f32.mrb[6].mxu0 }
 0x2bd   : > { %4570 = vst [vmem:[%s7823_s26 + $0x10] sm:$0xff] %v4506_v38  ;;  %v4507_v27 = vmax.f32 %v4379_v41, %v4443_v48  ;;  %v4311_v8 = vmul.f32 %v5997_v56, %v7805_v30  ;;  %v5999_v10 = vadd.f32 %v5934_v45, %v5604_v55  ;;  %v3998_v58 = vpop.f32.mrb[7].mxu0 }
 0x2be   : > { %4568 = vst [vmem:[%s7823_s26] sm:$0xff] %v4504_v47  ;;  %v4505_v50 = vmax.f32 %v4377_v4, %v4441_v52  ;;  %v4309_v43 = vmul.f32 %v5998_v63, %v7805_v30  ;;  %v6000_v36 = vadd.f32 %v3998_v58, %v7752_v14 }
 0x2bf   : > { %4571 = vst [vmem:[%s7823_s26 + $0x18] sm:$0xff] %v4507_v27  ;;  %v4382_v31 = vadd.f32 %v7810_v26, %v4311_v8  ;;  %v4312_v2 = vmul.f32 %v5999_v10, %v7805_v30 }
 0x2c0   : > { %4569 = vst [vmem:[%s7823_s26 + $0x8] sm:$0xff] %v4505_v50  ;;  %v4380_v46 = vadd.f32 %v7810_v26, %v4309_v43  ;;  %v4310_v16 = vmul.f32 %v6000_v36, %v7805_v30 }
 0x2c1   : > { %v4446_v59 = vmul.f32 0.01, %v4382_v31  ;;  %v4383_v55 = vadd.f32 %v7810_v26, %v4312_v2 }
 0x2c2   : > { %v4444_v7 = vmul.f32 0.01, %v4380_v46  ;;  %v4381_v34 = vadd.f32 %v7810_v26, %v4310_v16  ;;  %v5937_v5 = vpop.f32.mrb[8].mxu0 }
 0x2c3   : > { %v4510_v14 = vmax.f32 %v4382_v31, %v4446_v59  ;;  %v4447_v9 = vmul.f32 0.01, %v4383_v55  ;;  %v6001_v40 = vadd.f32 %v5937_v5, %v7754_v11  ;;  %v4011_v44 = vpop.f32.mrb[9].mxu0 }
 0x2c4   : > { %v4508_v51 = vmax.f32 %v4380_v46, %v4444_v7  ;;  %v4445_v0 = vmul.f32 0.01, %v4381_v34  ;;  %v6002_v18 = vadd.f32 %v4011_v44, %v7756_v42  ;;  %v5938_v19 = vpop.f32.mrb[10].mxu0 }
 0x2c5   : > { %4574 = vst [vmem:[%s7823_s26 + $0x30] sm:$0xff] %v4510_v14  ;;  %v4511_v24 = vmax.f32 %v4383_v55, %v4447_v9  ;;  %v4315_v32 = vmul.f32 %v6001_v40, %v7805_v30  ;;  %v6003_v41 = vadd.f32 %v5938_v19, %v7758_v39  ;;  %v4014_v62 = vpop.f32.mrb[11].mxu0 }
 0x2c6   : > { %4572 = vst [vmem:[%s7823_s26 + $0x20] sm:$0xff] %v4508_v51  ;;  %v4509_v4 = vmax.f32 %v4381_v34, %v4445_v0  ;;  %v4313_v20 = vmul.f32 %v6002_v18, %v7805_v30  ;;  %v6004_v11 = vadd.f32 %v4014_v62, %v7760_v3 }
 0x2c7   : > { %4575 = vst [vmem:[%s7823_s26 + $0x38] sm:$0xff] %v4511_v24  ;;  %v4386_v38 = vadd.f32 %v7810_v26, %v4315_v32  ;;  %v4316_v48 = vmul.f32 %v6003_v41, %v7805_v30 }
 0x2c8   : > { %4573 = vst [vmem:[%s7823_s26 + $0x28] sm:$0xff] %v4509_v4  ;;  %v4384_v42 = vadd.f32 %v7810_v26, %v4313_v20  ;;  %v4314_v56 = vmul.f32 %v6004_v11, %v7805_v30 }
 0x2c9   : > { %v4450_v60 = vmul.f32 0.01, %v4386_v38  ;;  %v4387_v39 = vadd.f32 %v7810_v26, %v4316_v48 }
 0x2ca   : > { %v4448_v47 = vmul.f32 0.01, %v4384_v42  ;;  %v4385_v52 = vadd.f32 %v7810_v26, %v4314_v56  ;;  %v5941_v63 = vpop.f32.mrb[12].mxu0 }
 0x2cb   : > { %v4514_v3 = vmax.f32 %v4386_v38, %v4450_v60  ;;  %v4451_v45 = vmul.f32 0.01, %v4387_v39  ;;  %v6005_v27 = vadd.f32 %v5941_v63, %v7762_v23  ;;  %v4027_v8 = vpop.f32.mrb[13].mxu0 }
 0x2cc   : > { %v4512_v10 = vmax.f32 %v4384_v42, %v4448_v47  ;;  %v4449_v58 = vmul.f32 0.01, %v4385_v52  ;;  %v6006_v50 = vadd.f32 %v4027_v8, %v7764_v12  ;;  %v5942_v43 = vpop.f32.mrb[14].mxu0 }
 0x2cd   : > { %4578 = vst [vmem:[%s7823_s26 + $0x50] sm:$0xff] %v4514_v3  ;;  %v4515_v36 = vmax.f32 %v4387_v39, %v4451_v45  ;;  %v4319_v31 = vmul.f32 %v6005_v27, %v7805_v30  ;;  %v6007_v2 = vadd.f32 %v5942_v43, %v7766_v33  ;;  %v4030_v46 = vpop.f32.mrb[15].mxu0 }
 0x2ce   : > { %4576 = vst [vmem:[%s7823_s26 + $0x40] sm:$0xff] %v4512_v10  ;;  %v4513_v16 = vmax.f32 %v4385_v52, %v4449_v58  ;;  %v4317_v59 = vmul.f32 %v6006_v50, %v7805_v30  ;;  %v6008_v23 = vadd.f32 %v4030_v46, %v7768_v13 }
 0x2cf   : > { %4579 = vst [vmem:[%s7823_s26 + $0x58] sm:$0xff] %v4515_v36  ;;  %v4390_v55 = vadd.f32 %v7810_v26, %v4319_v31  ;;  %v4320_v7 = vmul.f32 %v6007_v2, %v7805_v30 }
 0x2d0   : > { %4577 = vst [vmem:[%s7823_s26 + $0x48] sm:$0xff] %v4513_v16  ;;  %v4388_v12 = vadd.f32 %v7810_v26, %v4317_v59  ;;  %v4318_v34 = vmul.f32 %v6008_v23, %v7805_v30 }
 0x2d1   : > { %v4454_v5 = vmul.f32 0.01, %v4390_v55  ;;  %v4391_v33 = vadd.f32 %v7810_v26, %v4320_v7 }
 0x2d2   : > { %v4452_v14 = vmul.f32 0.01, %v4388_v12  ;;  %v4389_v9 = vadd.f32 %v7810_v26, %v4318_v34  ;;  %v5945_v40 = vpop.f32.mrb[16].mxu0 }
 0x2d3   : > { %v4518_v13 = vmax.f32 %v4390_v55, %v4454_v5  ;;  %v4455_v44 = vmul.f32 0.01, %v4391_v33  ;;  %v6009_v51 = vadd.f32 %v5945_v40, %v7770_v29  ;;  %v4043_v0 = vpop.f32.mrb[17].mxu0 }
 0x2d4   : > { %v4516_v18 = vmax.f32 %v4388_v12, %v4452_v14  ;;  %v4453_v19 = vmul.f32 0.01, %v4389_v9  ;;  %v6010_v24 = vadd.f32 %v4043_v0, %v7772_v6  ;;  %v5946_v32 = vpop.f32.mrb[18].mxu0 }
 0x2d5   : > { %4582 = vst [vmem:[%s7823_s26 + $0x70] sm:$0xff] %v4518_v13  ;;  %v4519_v41 = vmax.f32 %v4391_v33, %v4455_v44  ;;  %v4323_v62 = vmul.f32 %v6009_v51, %v7805_v30  ;;  %v6011_v4 = vadd.f32 %v5946_v32, %v7774_v1  ;;  %v4046_v20 = vpop.f32.mrb[19].mxu0 }
 0x2d6   : > { %4580 = vst [vmem:[%s7823_s26 + $0x60] sm:$0xff] %v4516_v18  ;;  %v4517_v11 = vmax.f32 %v4389_v9, %v4453_v19  ;;  %v4321_v38 = vmul.f32 %v6010_v24, %v7805_v30  ;;  %v6012_v29 = vadd.f32 %v4046_v20, %v7776_v35 }
 0x2d7   : > { %4583 = vst [vmem:[%s7823_s26 + $0x78] sm:$0xff] %v4519_v41  ;;  %v4394_v48 = vadd.f32 %v7810_v26, %v4323_v62  ;;  %v4324_v42 = vmul.f32 %v6011_v4, %v7805_v30 }
 0x2d8   : > { %4581 = vst [vmem:[%s7823_s26 + $0x68] sm:$0xff] %v4517_v11  ;;  %v4392_v6 = vadd.f32 %v7810_v26, %v4321_v38  ;;  %v4322_v56 = vmul.f32 %v6012_v29, %v7805_v30 }
 0x2d9   : > { %v4458_v60 = vmul.f32 0.01, %v4394_v48  ;;  %v4395_v1 = vadd.f32 %v7810_v26, %v4324_v42 }
 0x2da   : > { %v4456_v39 = vmul.f32 0.01, %v4392_v6  ;;  %v4393_v47 = vadd.f32 %v7810_v26, %v4322_v56  ;;  %v5949_v52 = vpop.f32.mrb[20].mxu0 }
 0x2db   : > { %v4522_v35 = vmax.f32 %v4394_v48, %v4458_v60  ;;  %v4459_v63 = vmul.f32 0.01, %v4395_v1  ;;  %v6013_v3 = vadd.f32 %v5949_v52, %v7778_v17  ;;  %v4059_v45 = vpop.f32.mrb[21].mxu0 }
 0x2dc   : > { %v4520_v27 = vmax.f32 %v4392_v6, %v4456_v39  ;;  %v4457_v8 = vmul.f32 0.01, %v4393_v47  ;;  %v6014_v10 = vadd.f32 %v4059_v45, %v7780_v37  ;;  %v5950_v58 = vpop.f32.mrb[22].mxu0 }
 0x2dd   : > { %4586 = vst [vmem:[%s7823_s26 + $0x90] sm:$0xff] %v4522_v35  ;;  %v4523_v50 = vmax.f32 %v4395_v1, %v4459_v63  ;;  %v4327_v43 = vmul.f32 %v6013_v3, %v7805_v30  ;;  %v6015_v36 = vadd.f32 %v5950_v58, %v7782_v22  ;;  %v4062_v31 = vpop.f32.mrb[23].mxu0 }
 0x2de   : > { %4584 = vst [vmem:[%s7823_s26 + $0x80] sm:$0xff] %v4520_v27  ;;  %v4521_v2 = vmax.f32 %v4393_v47, %v4457_v8  ;;  %v4325_v46 = vmul.f32 %v6014_v10, %v7805_v30  ;;  %v6016_v17 = vadd.f32 %v4062_v31, %v7784_v57 }
 0x2df   : > { %4587 = vst [vmem:[%s7823_s26 + $0x98] sm:$0xff] %v4523_v50  ;;  %v4398_v16 = vadd.f32 %v7810_v26, %v4327_v43  ;;  %v4328_v59 = vmul.f32 %v6015_v36, %v7805_v30 }
 0x2e0   : > { %4585 = vst [vmem:[%s7823_s26 + $0x88] sm:$0xff] %v4521_v2  ;;  %v4396_v37 = vadd.f32 %v7810_v26, %v4325_v46  ;;  %v4326_v23 = vmul.f32 %v6016_v17, %v7805_v30 }
 0x2e1   : > { %v4462_v55 = vmul.f32 0.01, %v4398_v16  ;;  %v4399_v22 = vadd.f32 %v7810_v26, %v4328_v59 }
 0x2e2   : > { %v4460_v7 = vmul.f32 0.01, %v4396_v37  ;;  %v4397_v12 = vadd.f32 %v7810_v26, %v4326_v23  ;;  %v5953_v34 = vpop.f32.mrb[24].mxu0 }
 0x2e3   : > { %v4526_v57 = vmax.f32 %v4398_v16, %v4462_v55  ;;  %v4463_v5 = vmul.f32 0.01, %v4399_v22  ;;  %v6017_v33 = vadd.f32 %v5953_v34, %v7786_v54  ;;  %v4075_v14 = vpop.f32.mrb[25].mxu0 }
 0x2e4   : > { %v4524_v9 = vmax.f32 %v4396_v37, %v4460_v7  ;;  %v4461_v40 = vmul.f32 0.01, %v4397_v12  ;;  %v6018_v13 = vadd.f32 %v4075_v14, %v7788_v28  ;;  %v5954_v44 = vpop.f32.mrb[26].mxu0 }
 0x2e5   : > { %4590 = vst [vmem:[%s7823_s26 + $0xb0] sm:$0xff] %v4526_v57  ;;  %v4527_v51 = vmax.f32 %v4399_v22, %v4463_v5  ;;  %v4331_v0 = vmul.f32 %v6017_v33, %v7805_v30  ;;  %v6019_v18 = vadd.f32 %v5954_v44, %v7790_v15  ;;  %v4078_v19 = vpop.f32.mrb[27].mxu0 }
 0x2e6   : > { %4588 = vst [vmem:[%s7823_s26 + $0xa0] sm:$0xff] %v4524_v9  ;;  %v4525_v24 = vmax.f32 %v4397_v12, %v4461_v40  ;;  %v4329_v32 = vmul.f32 %v6018_v13, %v7805_v30  ;;  %v6020_v54 = vadd.f32 %v4078_v19, %v7792_v49 }
 0x2e7   : > { %4591 = vst [vmem:[%s7823_s26 + $0xb8] sm:$0xff] %v4527_v51  ;;  %v4402_v41 = vadd.f32 %v7810_v26, %v4331_v0  ;;  %v4332_v62 = vmul.f32 %v6019_v18, %v7805_v30 }
 0x2e8   : > { %4589 = vst [vmem:[%s7823_s26 + $0xa8] sm:$0xff] %v4525_v24  ;;  %v4400_v28 = vadd.f32 %v7810_v26, %v4329_v32  ;;  %v4330_v4 = vmul.f32 %v6020_v54, %v7805_v30 }
 0x2e9   : > { %v4466_v20 = vmul.f32 0.01, %v4402_v41  ;;  %v4403_v15 = vadd.f32 %v7810_v26, %v4332_v62 }
 0x2ea   : > { %v4464_v11 = vmul.f32 0.01, %v4400_v28  ;;  %v4401_v38 = vadd.f32 %v7810_v26, %v4330_v4  ;;  %v5957_v29 = vpop.f32.mrb[28].mxu0 }
 0x2eb   : > { %v4530_v49 = vmax.f32 %v4402_v41, %v4466_v20  ;;  %v4467_v48 = vmul.f32 0.01, %v4403_v15  ;;  %v6021_v42 = vadd.f32 %v5957_v29, %v7794_v25  ;;  %v4091_v6 = vpop.f32.mrb[29].mxu0 }
 0x2ec   : > { %v4528_v56 = vmax.f32 %v4400_v28, %v4464_v11  ;;  %v4465_v60 = vmul.f32 0.01, %v4401_v38  ;;  %v6022_v1 = vadd.f32 %v4091_v6, %v7796_v53  ;;  %v5958_v39 = vpop.f32.mrb[30].mxu0 }
 0x2ed   : > { %4594 = vst [vmem:[%s7823_s26 + $0xd0] sm:$0xff] %v4530_v49  ;;  %v4531_v47 = vmax.f32 %v4403_v15, %v4467_v48  ;;  %v4335_v52 = vmul.f32 %v6021_v42, %v7805_v30  ;;  %v6023_v35 = vadd.f32 %v5958_v39, %v7798_v21  ;;  %v4094_v63 = vpop.f32.mrb[31].mxu0 }
 0x2ee   : > { %4592 = vst [vmem:[%s7823_s26 + $0xc0] sm:$0xff] %v4528_v56  ;;  %v4529_v3 = vmax.f32 %v4401_v38, %v4465_v60  ;;  %v4333_v45 = vmul.f32 %v6022_v1, %v7805_v30  ;;  %v6024_v25 = vadd.f32 %v4094_v63, %v7800_v61 }
 0x2ef   : > { %4595 = vst [vmem:[%s7823_s26 + $0xd8] sm:$0xff] %v4531_v47  ;;  %v4406_v27 = vadd.f32 %v7810_v26, %v4335_v52  ;;  %v4336_v8 = vmul.f32 %v6023_v35, %v7805_v30 }
 0x2f0   : > { %v5697_v53 = vpop.f32.mrb[32].mxu1  ;;  %4593 = vst [vmem:[%s7823_s26 + $0xc8] sm:$0xff] %v4529_v3  ;;  %v4404_v10 = vadd.f32 %v7810_v26, %v4333_v45  ;;  %v4334_v58 = vmul.f32 %v6024_v25, %v7805_v30 }
 0x2f1   : > { %v2600_v50 = vpop.f32.mrb[33].mxu1  ;;  %v4470_v21 = vmul.f32 0.01, %v4406_v27  ;;  %v4407_v43 = vadd.f32 %v7810_v26, %v4336_v8 }
 0x2f2   : > { %v5698_v36 = vpop.f32.mrb[34].mxu1  ;;  %v4468_v31 = vmul.f32 0.01, %v4404_v10  ;;  %v4405_v61 = vadd.f32 %v7810_v26, %v4334_v58  ;;  %v5961_v2 = vpop.f32.mrb[32].mxu0 }
 0x2f3   : > { %v2603_v46 = vpop.f32.mrb[35].mxu1  ;;  %v4534_v17 = vmax.f32 %v4406_v27, %v4470_v21  ;;  %v4471_v16 = vmul.f32 0.01, %v4407_v43  ;;  %v6025_v59 = vadd.f32 %v5961_v2, %v5697_v53  ;;  %v4107_v37 = vpop.f32.mrb[33].mxu0 }
 0x2f4   : > { %v4532_v23 = vmax.f32 %v4404_v10, %v4468_v31  ;;  %v4469_v55 = vmul.f32 0.01, %v4405_v61  ;;  %v6026_v22 = vadd.f32 %v4107_v37, %v2600_v50  ;;  %v5962_v7 = vpop.f32.mrb[34].mxu0 }
 0x2f5   : > { %4598 = vst [vmem:[%s7823_s26 + $0xf0] sm:$0xff] %v4534_v17  ;;  %v4535_v12 = vmax.f32 %v4407_v43, %v4471_v16  ;;  %v4339_v34 = vmul.f32 %v6025_v59, %v7805_v30  ;;  %v6027_v57 = vadd.f32 %v5962_v7, %v5698_v36  ;;  %v4110_v5 = vpop.f32.mrb[35].mxu0 }
 0x2f6   : > { %4596 = vst [vmem:[%s7823_s26 + $0xe0] sm:$0xff] %v4532_v23  ;;  %v4533_v33 = vmax.f32 %v4405_v61, %v4469_v55  ;;  %v4337_v14 = vmul.f32 %v6026_v22, %v7805_v30  ;;  %v6028_v9 = vadd.f32 %v4110_v5, %v2603_v46 }
 0x2f7   : > { %4599 = vst [vmem:[%s7823_s26 + $0xf8] sm:$0xff] %v4535_v12  ;;  %v4410_v40 = vadd.f32 %v7810_v26, %v4339_v34  ;;  %v4340_v13 = vmul.f32 %v6027_v57, %v7805_v30 }
 0x2f8   : > { %v5701_v44 = vpop.f32.mrb[36].mxu1  ;;  %4597 = vst [vmem:[%s7823_s26 + $0xe8] sm:$0xff] %v4533_v33  ;;  %v4408_v51 = vadd.f32 %v7810_v26, %v4337_v14  ;;  %v4338_v0 = vmul.f32 %v6028_v9, %v7805_v30 }
 0x2f9   : > { %v2616_v18 = vpop.f32.mrb[37].mxu1  ;;  %v4474_v19 = vmul.f32 0.01, %v4410_v40  ;;  %v4411_v24 = vadd.f32 %v7810_v26, %v4340_v13 }
 0x2fa   : > { %v5702_v32 = vpop.f32.mrb[38].mxu1  ;;  %v4472_v54 = vmul.f32 0.01, %v4408_v51  ;;  %v4409_v41 = vadd.f32 %v7810_v26, %v4338_v0  ;;  %v5965_v62 = vpop.f32.mrb[36].mxu0 }
 0x2fb   : > { %v2619_v28 = vpop.f32.mrb[39].mxu1  ;;  %v4538_v4 = vmax.f32 %v4410_v40, %v4474_v19  ;;  %v4475_v20 = vmul.f32 0.01, %v4411_v24  ;;  %v6029_v15 = vadd.f32 %v5965_v62, %v5701_v44  ;;  %v4123_v11 = vpop.f32.mrb[37].mxu0 }
 0x2fc   : > { %v4536_v38 = vmax.f32 %v4408_v51, %v4472_v54  ;;  %v4473_v29 = vmul.f32 0.01, %v4409_v41  ;;  %v6030_v49 = vadd.f32 %v4123_v11, %v2616_v18  ;;  %v5966_v48 = vpop.f32.mrb[38].mxu0 }
 0x2fd   : > { %4602 = vst [vmem:[%s7823_s26 + $0x110] sm:$0xff] %v4538_v4  ;;  %v4539_v42 = vmax.f32 %v4411_v24, %v4475_v20  ;;  %v4343_v6 = vmul.f32 %v6029_v15, %v7805_v30  ;;  %v6031_v56 = vadd.f32 %v5966_v48, %v5702_v32  ;;  %v4126_v60 = vpop.f32.mrb[39].mxu0 }
 0x2fe   : > { %4600 = vst [vmem:[%s7823_s26 + $0x100] sm:$0xff] %v4536_v38  ;;  %v4537_v1 = vmax.f32 %v4409_v41, %v4473_v29  ;;  %v4341_v39 = vmul.f32 %v6030_v49, %v7805_v30  ;;  %v6032_v47 = vadd.f32 %v4126_v60, %v2619_v28 }
 0x2ff   : > { %4603 = vst [vmem:[%s7823_s26 + $0x118] sm:$0xff] %v4539_v42  ;;  %v4414_v52 = vadd.f32 %v7810_v26, %v4343_v6  ;;  %v4344_v35 = vmul.f32 %v6031_v56, %v7805_v30 }
 0x300   : > { %v5705_v63 = vpop.f32.mrb[40].mxu1  ;;  %4601 = vst [vmem:[%s7823_s26 + $0x108] sm:$0xff] %v4537_v1  ;;  %v4412_v3 = vadd.f32 %v7810_v26, %v4341_v39  ;;  %v4342_v45 = vmul.f32 %v6032_v47, %v7805_v30 }
 0x301   : > { %v2632_v25 = vpop.f32.mrb[41].mxu1  ;;  %v4478_v27 = vmul.f32 0.01, %v4414_v52  ;;  %v4415_v8 = vadd.f32 %v7810_v26, %v4344_v35 }
 0x302   : > { %v5706_v53 = vpop.f32.mrb[42].mxu1  ;;  %v4476_v10 = vmul.f32 0.01, %v4412_v3  ;;  %v4413_v58 = vadd.f32 %v7810_v26, %v4342_v45  ;;  %v5969_v50 = vpop.f32.mrb[40].mxu0 }
 0x303   : > { %v2635_v21 = vpop.f32.mrb[43].mxu1  ;;  %v4542_v43 = vmax.f32 %v4414_v52, %v4478_v27  ;;  %v4479_v36 = vmul.f32 0.01, %v4415_v8  ;;  %v6033_v31 = vadd.f32 %v5969_v50, %v5705_v63  ;;  %v4139_v61 = vpop.f32.mrb[41].mxu0 }
 0x304   : > { %v4540_v2 = vmax.f32 %v4412_v3, %v4476_v10  ;;  %v4477_v46 = vmul.f32 0.01, %v4413_v58  ;;  %v6034_v17 = vadd.f32 %v4139_v61, %v2632_v25  ;;  %v5970_v16 = vpop.f32.mrb[42].mxu0 }
 0x305   : > { %4606 = vst [vmem:[%s7823_s26 + $0x130] sm:$0xff] %v4542_v43  ;;  %v4543_v59 = vmax.f32 %v4415_v8, %v4479_v36  ;;  %v4347_v37 = vmul.f32 %v6033_v31, %v7805_v30  ;;  %v6035_v23 = vadd.f32 %v5970_v16, %v5706_v53  ;;  %v4142_v55 = vpop.f32.mrb[43].mxu0 }
 0x306   : > { %4604 = vst [vmem:[%s7823_s26 + $0x120] sm:$0xff] %v4540_v2  ;;  %v4541_v22 = vmax.f32 %v4413_v58, %v4477_v46  ;;  %v4345_v7 = vmul.f32 %v6034_v17, %v7805_v30  ;;  %v6036_v12 = vadd.f32 %v4142_v55, %v2635_v21 }
 0x307   : > { %4607 = vst [vmem:[%s7823_s26 + $0x138] sm:$0xff] %v4543_v59  ;;  %v4418_v34 = vadd.f32 %v7810_v26, %v4347_v37  ;;  %v4348_v57 = vmul.f32 %v6035_v23, %v7805_v30 }
 0x308   : > { %v5709_v5 = vpop.f32.mrb[44].mxu1  ;;  %4605 = vst [vmem:[%s7823_s26 + $0x128] sm:$0xff] %v4541_v22  ;;  %v4416_v33 = vadd.f32 %v7810_v26, %v4345_v7  ;;  %v4346_v14 = vmul.f32 %v6036_v12, %v7805_v30 }
 0x309   : > { %v2648_v9 = vpop.f32.mrb[45].mxu1  ;;  %v4482_v40 = vmul.f32 0.01, %v4418_v34  ;;  %v4419_v13 = vadd.f32 %v7810_v26, %v4348_v57 }
 0x30a   : > { %v5710_v44 = vpop.f32.mrb[46].mxu1  ;;  %v4480_v51 = vmul.f32 0.01, %v4416_v33  ;;  %v4417_v0 = vadd.f32 %v7810_v26, %v4346_v14  ;;  %v5973_v18 = vpop.f32.mrb[44].mxu0 }
 0x30b   : > { %v2651_v19 = vpop.f32.mrb[47].mxu1  ;;  %v4546_v24 = vmax.f32 %v4418_v34, %v4482_v40  ;;  %v4483_v32 = vmul.f32 0.01, %v4419_v13  ;;  %v6037_v54 = vadd.f32 %v5973_v18, %v5709_v5  ;;  %v4155_v41 = vpop.f32.mrb[45].mxu0 }
 0x30c   : > { %v4544_v62 = vmax.f32 %v4416_v33, %v4480_v51  ;;  %v4481_v28 = vmul.f32 0.01, %v4417_v0  ;;  %v6038_v4 = vadd.f32 %v4155_v41, %v2648_v9  ;;  %v5974_v20 = vpop.f32.mrb[46].mxu0 }
 0x30d   : > { %4610 = vst [vmem:[%s7823_s26 + $0x150] sm:$0xff] %v4546_v24  ;;  %v4547_v15 = vmax.f32 %v4419_v13, %v4483_v32  ;;  %v4351_v11 = vmul.f32 %v6037_v54, %v7805_v30  ;;  %v6039_v38 = vadd.f32 %v5974_v20, %v5710_v44  ;;  %v4158_v29 = vpop.f32.mrb[47].mxu0 }
 0x30e   : > { %4608 = vst [vmem:[%s7823_s26 + $0x140] sm:$0xff] %v4544_v62  ;;  %v4545_v49 = vmax.f32 %v4417_v0, %v4481_v28  ;;  %v4349_v48 = vmul.f32 %v6038_v4, %v7805_v30  ;;  %v6040_v42 = vadd.f32 %v4158_v29, %v2651_v19 }
 0x30f   : > { %4611 = vst [vmem:[%s7823_s26 + $0x158] sm:$0xff] %v4547_v15  ;;  %v4422_v6 = vadd.f32 %v7810_v26, %v4351_v11  ;;  %v4352_v56 = vmul.f32 %v6039_v38, %v7805_v30 }
 0x310   : > { %v5713_v60 = vpop.f32.mrb[48].mxu1  ;;  %4609 = vst [vmem:[%s7823_s26 + $0x148] sm:$0xff] %v4545_v49  ;;  %v4420_v1 = vadd.f32 %v7810_v26, %v4349_v48  ;;  %v4350_v39 = vmul.f32 %v6040_v42, %v7805_v30 }
 0x311   : > { %v2664_v47 = vpop.f32.mrb[49].mxu1  ;;  %v4486_v52 = vmul.f32 0.01, %v4422_v6  ;;  %v4423_v35 = vadd.f32 %v7810_v26, %v4352_v56 }
 0x312   : > { %v5714_v63 = vpop.f32.mrb[50].mxu1  ;;  %v4484_v3 = vmul.f32 0.01, %v4420_v1  ;;  %v4421_v45 = vadd.f32 %v7810_v26, %v4350_v39  ;;  %v5977_v25 = vpop.f32.mrb[48].mxu0 }
 0x313   : > { %v2667_v27 = vpop.f32.mrb[51].mxu1  ;;  %v4550_v8 = vmax.f32 %v4422_v6, %v4486_v52  ;;  %v4487_v53 = vmul.f32 0.01, %v4423_v35  ;;  %v6041_v10 = vadd.f32 %v5977_v25, %v5713_v60  ;;  %v4171_v58 = vpop.f32.mrb[49].mxu0 }
 0x314   : > { %v4548_v50 = vmax.f32 %v4420_v1, %v4484_v3  ;;  %v4485_v21 = vmul.f32 0.01, %v4421_v45  ;;  %v6042_v43 = vadd.f32 %v4171_v58, %v2664_v47  ;;  %v5978_v36 = vpop.f32.mrb[50].mxu0 }
 0x315   : > { %4614 = vst [vmem:[%s7823_s26 + $0x170] sm:$0xff] %v4550_v8  ;;  %v4551_v31 = vmax.f32 %v4423_v35, %v4487_v53  ;;  %v4355_v61 = vmul.f32 %v6041_v10, %v7805_v30  ;;  %v6043_v2 = vadd.f32 %v5978_v36, %v5714_v63  ;;  %v4174_v46 = vpop.f32.mrb[51].mxu0 }
 0x316   : > { %4612 = vst [vmem:[%s7823_s26 + $0x160] sm:$0xff] %v4548_v50  ;;  %v4549_v17 = vmax.f32 %v4421_v45, %v4485_v21  ;;  %v4353_v16 = vmul.f32 %v6042_v43, %v7805_v30  ;;  %v6044_v59 = vadd.f32 %v4174_v46, %v2667_v27 }
 0x317   : > { %4615 = vst [vmem:[%s7823_s26 + $0x178] sm:$0xff] %v4551_v31  ;;  %v4426_v37 = vadd.f32 %v7810_v26, %v4355_v61  ;;  %v4356_v23 = vmul.f32 %v6043_v2, %v7805_v30 }
 0x318   : > { %v5717_v55 = vpop.f32.mrb[52].mxu1  ;;  %4613 = vst [vmem:[%s7823_s26 + $0x168] sm:$0xff] %v4549_v17  ;;  %v4424_v22 = vadd.f32 %v7810_v26, %v4353_v16  ;;  %v4354_v7 = vmul.f32 %v6044_v59, %v7805_v30 }
 0x319   : > { %v2680_v12 = vpop.f32.mrb[53].mxu1  ;;  %v4490_v34 = vmul.f32 0.01, %v4426_v37  ;;  %v4427_v57 = vadd.f32 %v7810_v26, %v4356_v23 }
 0x31a   : > { %v5718_v5 = vpop.f32.mrb[54].mxu1  ;;  %v4488_v33 = vmul.f32 0.01, %v4424_v22  ;;  %v4425_v14 = vadd.f32 %v7810_v26, %v4354_v7  ;;  %v5981_v9 = vpop.f32.mrb[52].mxu0 }
 0x31b   : > { %v2683_v40 = vpop.f32.mrb[55].mxu1  ;;  %v4554_v13 = vmax.f32 %v4426_v37, %v4490_v34  ;;  %v4491_v44 = vmul.f32 0.01, %v4427_v57  ;;  %v6045_v51 = vadd.f32 %v5981_v9, %v5717_v55  ;;  %v4187_v0 = vpop.f32.mrb[53].mxu0 }
 0x31c   : > { %v4552_v18 = vmax.f32 %v4424_v22, %v4488_v33  ;;  %v4489_v19 = vmul.f32 0.01, %v4425_v14  ;;  %v6046_v24 = vadd.f32 %v4187_v0, %v2680_v12  ;;  %v5982_v32 = vpop.f32.mrb[54].mxu0 }
 0x31d   : > { %4618 = vst [vmem:[%s7823_s26 + $0x190] sm:$0xff] %v4554_v13  ;;  %v4555_v54 = vmax.f32 %v4427_v57, %v4491_v44  ;;  %v4359_v41 = vmul.f32 %v6045_v51, %v7805_v30  ;;  %v6047_v62 = vadd.f32 %v5982_v32, %v5718_v5  ;;  %v4190_v28 = vpop.f32.mrb[55].mxu0 }
 0x31e   : > { %4616 = vst [vmem:[%s7823_s26 + $0x180] sm:$0xff] %v4552_v18  ;;  %v4553_v4 = vmax.f32 %v4425_v14, %v4489_v19  ;;  %v4357_v20 = vmul.f32 %v6046_v24, %v7805_v30  ;;  %v6048_v15 = vadd.f32 %v4190_v28, %v2683_v40 }
 0x31f   : > { %4619 = vst [vmem:[%s7823_s26 + $0x198] sm:$0xff] %v4555_v54  ;;  %v4430_v11 = vadd.f32 %v7810_v26, %v4359_v41  ;;  %v4360_v38 = vmul.f32 %v6047_v62, %v7805_v30 }
 0x320   : > { %v5721_v29 = vpop.f32.mrb[56].mxu1  ;;  %4617 = vst [vmem:[%s7823_s26 + $0x188] sm:$0xff] %v4553_v4  ;;  %v4428_v49 = vadd.f32 %v7810_v26, %v4357_v20  ;;  %v4358_v48 = vmul.f32 %v6048_v15, %v7805_v30 }
 0x321   : > { %v2696_v42 = vpop.f32.mrb[57].mxu1  ;;  %v4494_v6 = vmul.f32 0.01, %v4430_v11  ;;  %v4431_v56 = vadd.f32 %v7810_v26, %v4360_v38 }
 0x322   : > { %v5722_v60 = vpop.f32.mrb[58].mxu1  ;;  %v4492_v1 = vmul.f32 0.01, %v4428_v49  ;;  %v4429_v39 = vadd.f32 %v7810_v26, %v4358_v48  ;;  %v5985_v47 = vpop.f32.mrb[56].mxu0 }
 0x323   : > { %v2699_v52 = vpop.f32.mrb[59].mxu1  ;;  %v4558_v35 = vmax.f32 %v4430_v11, %v4494_v6  ;;  %v4495_v63 = vmul.f32 0.01, %v4431_v56  ;;  %v6049_v3 = vadd.f32 %v5985_v47, %v5721_v29  ;;  %v4203_v45 = vpop.f32.mrb[57].mxu0 }
 0x324   : > { %v4556_v25 = vmax.f32 %v4428_v49, %v4492_v1  ;;  %v4493_v27 = vmul.f32 0.01, %v4429_v39  ;;  %v6050_v8 = vadd.f32 %v4203_v45, %v2696_v42  ;;  %v5986_v53 = vpop.f32.mrb[58].mxu0 }
 0x325   : > { %4622 = vst [vmem:[%s7823_s26 + $0x1b0] sm:$0xff] %v4558_v35  ;;  %v4559_v10 = vmax.f32 %v4431_v56, %v4495_v63  ;;  %v4363_v58 = vmul.f32 %v6049_v3, %v7805_v30  ;;  %v6051_v50 = vadd.f32 %v5986_v53, %v5722_v60  ;;  %v4206_v21 = vpop.f32.mrb[59].mxu0 }
 0x326   : > { %4620 = vst [vmem:[%s7823_s26 + $0x1a0] sm:$0xff] %v4556_v25  ;;  %v4557_v43 = vmax.f32 %v4429_v39, %v4493_v27  ;;  %v4361_v36 = vmul.f32 %v6050_v8, %v7805_v30  ;;  %v6052_v31 = vadd.f32 %v4206_v21, %v2699_v52 }
 0x327   : > { %4623 = vst [vmem:[%s7823_s26 + $0x1b8] sm:$0xff] %v4559_v10  ;;  %v4434_v61 = vadd.f32 %v7810_v26, %v4363_v58  ;;  %v4364_v2 = vmul.f32 %v6051_v50, %v7805_v30 }
 0x328   : > { %v5725_v46 = vpop.f32.mrb[60].mxu1  ;;  %4621 = vst [vmem:[%s7823_s26 + $0x1a8] sm:$0xff] %v4557_v43  ;;  %v4432_v17 = vadd.f32 %v7810_v26, %v4361_v36  ;;  %v4362_v16 = vmul.f32 %v6052_v31, %v7805_v30 }
 0x329   : > { %v2712_v59 = vpop.f32.mrb[61].mxu1  ;;  %v4498_v37 = vmul.f32 0.01, %v4434_v61  ;;  %v4435_v23 = vadd.f32 %v7810_v26, %v4364_v2 }
 0x32a   : > { %v5726_v55 = vpop.f32.mrb[62].mxu1  ;;  %v4496_v22 = vmul.f32 0.01, %v4432_v17  ;;  %v4433_v7 = vadd.f32 %v7810_v26, %v4362_v16  ;;  %v5989_v12 = vpop.f32.mrb[60].mxu0 }
 0x32b   : > { %v2715_v34 = vpop.f32.mrb[63].mxu1  ;;  %v4562_v57 = vmax.f32 %v4434_v61, %v4498_v37  ;;  %v4499_v5 = vmul.f32 0.01, %v4435_v23  ;;  %v6053_v33 = vadd.f32 %v5989_v12, %v5725_v46  ;;  %v4219_v14 = vpop.f32.mrb[61].mxu0 }
 0x32c   : > { %v4560_v9 = vmax.f32 %v4432_v17, %v4496_v22  ;;  %v4497_v40 = vmul.f32 0.01, %v4433_v7  ;;  %v6054_v13 = vadd.f32 %v4219_v14, %v2712_v59  ;;  %v5990_v44 = vpop.f32.mrb[62].mxu0 }
 0x32d   : > { %4626 = vst [vmem:[%s7823_s26 + $0x1d0] sm:$0xff] %v4562_v57  ;;  %v4563_v51 = vmax.f32 %v4435_v23, %v4499_v5  ;;  %v4367_v0 = vmul.f32 %v6053_v33, %v7805_v30  ;;  %v6055_v18 = vadd.f32 %v5990_v44, %v5726_v55  ;;  %v4222_v19 = vpop.f32.mrb[63].mxu0 }
 0x32e   : > { %4624 = vst [vmem:[%s7823_s26 + $0x1c0] sm:$0xff] %v4560_v9  ;;  %v4561_v24 = vmax.f32 %v4433_v7, %v4497_v40  ;;  %v4365_v32 = vmul.f32 %v6054_v13, %v7805_v30  ;;  %v6056_v54 = vadd.f32 %v4222_v19, %v2715_v34 }
 0x32f   : > { %4627 = vst [vmem:[%s7823_s26 + $0x1d8] sm:$0xff] %v4563_v51  ;;  %v4438_v41 = vadd.f32 %v7810_v26, %v4367_v0  ;;  %v4368_v62 = vmul.f32 %v6055_v18, %v7805_v30 }
 0x330   : > { %4625 = vst [vmem:[%s7823_s26 + $0x1c8] sm:$0xff] %v4561_v24  ;;  %v4436_v28 = vadd.f32 %v7810_v26, %v4365_v32  ;;  %v4366_v4 = vmul.f32 %v6056_v54, %v7805_v30 }
 0x331   : > { %v4502_v20 = vmul.f32 0.01, %v4438_v41  ;;  %v4439_v15 = vadd.f32 %v7810_v26, %v4368_v62 }
 0x332   : > { %v4500_v11 = vmul.f32 0.01, %v4436_v28  ;;  %v4437_v38 = vadd.f32 %v7810_v26, %v4366_v4 }
 0x333   : > { %v4566_v29 = vmax.f32 %v4438_v41, %v4502_v20  ;;  %v4503_v49 = vmul.f32 0.01, %v4439_v15 }
 0x334   : > { %v4564_v48 = vmax.f32 %v4436_v28, %v4500_v11  ;;  %v4501_v42 = vmul.f32 0.01, %v4437_v38 }
 0x335   : > { %4630 = vst [vmem:[%s7823_s26 + $0x1f0] sm:$0xff] %v4566_v29  ;;  %v4567_v6 = vmax.f32 %v4439_v15, %v4503_v49 }
 0x336   : > { %4628 = vst [vmem:[%s7823_s26 + $0x1e0] sm:$0xff] %v4564_v48  ;;  %v4565_v56 = vmax.f32 %v4437_v38, %v4501_v42 }
 0x337   : > { %4631 = vst [vmem:[%s7823_s26 + $0x1f8] sm:$0xff] %v4567_v6 }
 0x338   : > { %4629 = vst [vmem:[%s7823_s26 + $0x1e8] sm:$0xff] %v4565_v56 }
 0x339 PF: > { %s14_s17 = sadd.s32 1, %s6607_s17   ;;  %s8221_s15 = smov %s6603_s16 }
 0x33a   : > { %p11_p5 = scmp.ge.s32.totalorder %s14_s17, 4   ;;  %s8222_s16 = smov %s8224_s18 }
 0x33c   :  { %13 = sbr.rel (!%p11_p5) target bundleno = 2 (0x2), region = 83 }

</bundles_post_ra>
